<compile_context>
chip_gen: v6e
topology: v6e:2x2x1
jax: 0.10.0
libtpu: 0.0.40
codegen_flags: <defaults>
</compile_context>

<pallas_src>
import functools

import jax
import jax.numpy as jnp
from jax.experimental import pallas as pl
from jax.experimental.pallas import tpu as pltpu


def _msa_kernel(x_ref, wqkv_ref, bqkv_ref, wp_ref, bp_ref, o_ref, ctx_ref, *,
                num_heads, head_dim, n_valid, inv_scale, compute_dtype):
    bt, n_pad, emb = x_ref.shape          # batch tile, padded tokens, embedding
    H, D = num_heads, head_dim
    R = bt * n_pad

    # All batch-tile rows go through the projections as one (R, E) slab.
    x2 = x_ref[...].reshape(R, emb).astype(compute_dtype)

    # Key-padding mask, only materialized when tokens were actually padded.
    key_mask = None
    if n_pad > n_valid:
        kidx = jax.lax.broadcasted_iota(jnp.int32, (bt, n_pad, n_pad), 2)
        key_mask = kidx < n_valid

    # Static H-iteration loop (small, bounded); heads are split by the
    # per-head weight slices prepared in the wrapper, not by relayouting
    # activations inside the kernel.
    for h in range(H):
        w_h = wqkv_ref[h]                 # (E, 3D), compute_dtype
        b_h = bqkv_ref[h]                 # (1, 3D), f32
        qkv = jnp.dot(x2, w_h, preferred_element_type=jnp.float32) + b_h
        q = qkv[:, 0 * D:1 * D].reshape(bt, n_pad, D).astype(compute_dtype)
        k = qkv[:, 1 * D:2 * D].reshape(bt, n_pad, D).astype(compute_dtype)
        v = qkv[:, 2 * D:3 * D].reshape(bt, n_pad, D).astype(compute_dtype)

        # Scores + softmax in f32 (VPU/EUP); MXU matmuls use compute_dtype.
        s = jnp.einsum('bqd,bkd->bqk', q, k,
                       preferred_element_type=jnp.float32)        # (bt, N, N)
        if key_mask is not None:
            s = jnp.where(key_mask, s, -1e30)
        s_max = jnp.max(s, axis=-1, keepdims=True)
        p = jnp.exp(s - s_max)
        denom = jnp.sum(p, axis=-1, keepdims=True)
        # Exact reciprocal (EUP); 1/sqrt(E) scaling applied AFTER the softmax
        # as in the reference module.
        att = (p * (pl.reciprocal(denom) * inv_scale)).astype(compute_dtype)
        o_h = jnp.einsum('bqk,bkd->bqd', att, v,
                         preferred_element_type=jnp.float32)      # (bt, N, D)

        # Head merge: one static-lane-offset store per head into the (R, E)
        # scratch, so the projection below runs as a single K=E matmul.
        ctx_ref[:, h * D:(h + 1) * D] = o_h.reshape(R, D).astype(ctx_ref.dtype)

    out = jnp.dot(ctx_ref[...], wp_ref[...],
                  preferred_element_type=jnp.float32) + bp_ref[...]
    o_ref[...] = out.reshape(bt, n_pad, emb).astype(o_ref.dtype)


def _pack_params(params, num_heads, w_dtype):
    """Pack weights outside the kernel (trace-time JAX, free)."""
    wq, bq, wk, bk, wv, bv, wp, bp = params
    E = wq.shape[0]
    H = num_heads
    D = E // H

    def per_head(w):                      # (E, E) -> (H, E, D)
        return w.reshape(E, H, D).transpose(1, 0, 2)

    w_qkv = jnp.concatenate(
        [per_head(wq), per_head(wk), per_head(wv)], axis=-1)      # (H, E, 3D)
    b_qkv = jnp.concatenate(
        [bq.reshape(H, 1, D), bk.reshape(H, 1, D), bv.reshape(H, 1, D)],
        axis=-1)                                                  # (H, 1, 3D)
    return (w_qkv.astype(w_dtype),
            b_qkv.astype(jnp.float32),
            wp.astype(w_dtype),                                   # (E, E)
            bp.reshape(1, E).astype(jnp.float32))


def _round_up(v, m):
    return ((v + m - 1) // m) * m


def _default_vmem_limit_bytes():
    try:
        kind = jax.devices()[0].device_kind.lower()
    except Exception:
        kind = ""
    if "v2" in kind or "v3" in kind:
        return 12 * 1024 * 1024
    if "v7" in kind:                      # 64 MiB VMEM per TensorCore
        return 48 * 1024 * 1024
    if "v5" in kind or "v6" in kind:      # 128 MiB parts
        return 96 * 1024 * 1024
    return 48 * 1024 * 1024


def _pick_batch_tile(batch, n_pad, emb, num_heads, head_dim,
                     x_itemsize, w_itemsize, c_itemsize, vmem_limit_bytes):
    """Largest batch tile that fits a conservative VMEM budget."""
    H, D = num_heads, head_dim
    # Constant-index weight blocks are fetched once but still double-buffered.
    weight_bytes = 2 * ((H * emb * 3 * D + emb * emb) * w_itemsize
                        + (H * 3 * D + emb) * 4)
    budget = int(0.55 * vmem_limit_bytes) - weight_bytes
    per_row = (
        2 * n_pad * emb * x_itemsize      # x block (double-buffered)
        + 2 * n_pad * emb * x_itemsize    # output block (double-buffered)
        + n_pad * 3 * D * 4               # per-head qkv (f32)
        + 3 * n_pad * D * c_itemsize      # q/k/v operand casts
        + 2 * n_pad * n_pad * 4           # scores + probs (one head live)
        + n_pad * emb * c_itemsize        # ctx merge scratch
        + 2 * n_pad * emb * 4             # temporaries / relayout headroom
    )
    bt = max(1, budget // per_row)
    bt = int(min(bt, batch))
    # Keep several grid steps so x/out DMAs pipeline and both v7x TensorCores
    # get >= 2 iterations each on the 'parallel' axis.
    if batch >= 4:
        bt = min(bt, max(1, batch // 4))
    elif batch >= 2:
        bt = min(bt, max(1, batch // 2))
    while batch % bt:
        bt -= 1
    return bt


def msa_forward(x, params, *, num_heads, matmul_dtype=jnp.bfloat16,
                batch_tile=None, vmem_limit_bytes=None):
    B, N, E = x.shape
    assert E % num_heads == 0
    H = num_heads
    D = E // H

    # Lane-dense token padding; padded keys are masked inside the kernel and
    # padded output rows are sliced off below.
    lane_multiple = 128 if N >= 128 else 8
    n_pad = _round_up(N, lane_multiple)
    x_p = jnp.pad(x, ((0, 0), (0, n_pad - N), (0, 0))) if n_pad != N else x

    if vmem_limit_bytes is None:
        vmem_limit_bytes = _default_vmem_limit_bytes()

    w_qkv, b_qkv, wp_p, bp_p = _pack_params(params, num_heads, matmul_dtype)

    if batch_tile is None:
        itemsize = jnp.dtype(matmul_dtype).itemsize
        batch_tile = _pick_batch_tile(B, n_pad, E, H, D,
                                      x.dtype.itemsize, itemsize, itemsize,
                                      vmem_limit_bytes)
    batch_tile = max(1, min(int(batch_tile), B))
    while B % batch_tile:
        batch_tile -= 1

    kernel = functools.partial(
        _msa_kernel, num_heads=H, head_dim=D, n_valid=N,
        inv_scale=1.0 / (E ** 0.5), compute_dtype=matmul_dtype)

    out = pl.pallas_call(
        kernel,
        out_shape=jax.ShapeDtypeStruct((B, n_pad, E), x.dtype),
        grid_spec=pltpu.PrefetchScalarGridSpec(
            num_scalar_prefetch=0,
            grid=(B // batch_tile,),
            in_specs=[
                pl.BlockSpec((batch_tile, n_pad, E), lambda i: (i, 0, 0)),  # x
                pl.BlockSpec((H, E, 3 * D), lambda i: (0, 0, 0)),   # W_qkv/head
                pl.BlockSpec((H, 1, 3 * D), lambda i: (0, 0, 0)),   # b_qkv/head
                pl.BlockSpec((E, E), lambda i: (0, 0)),             # W_proj
                pl.BlockSpec((1, E), lambda i: (0, 0)),             # b_proj
            ],
            out_specs=pl.BlockSpec((batch_tile, n_pad, E), lambda i: (i, 0, 0)),
            scratch_shapes=[pltpu.VMEM((batch_tile * n_pad, E), matmul_dtype)],
        ),
        compiler_params=pltpu.CompilerParams(
            dimension_semantics=("parallel",),
            vmem_limit_bytes=int(vmem_limit_bytes),
        ),
    )(x_p, w_qkv, b_qkv, wp_p, bp_p)
    return out[:, :N, :] if n_pad != N else out


def init_params(key, emb_size):
    # Deterministic synthetic parameters (Linear: (in, out) weights + bias).
    keys = jax.random.split(key, 8)
    scale = 1.0 / (emb_size ** 0.5)
    wq = jax.random.normal(keys[0], (emb_size, emb_size), jnp.float32) * scale
    bq = jax.random.normal(keys[1], (emb_size,), jnp.float32) * 0.01
    wk = jax.random.normal(keys[2], (emb_size, emb_size), jnp.float32) * scale
    bk = jax.random.normal(keys[3], (emb_size,), jnp.float32) * 0.01
    wv = jax.random.normal(keys[4], (emb_size, emb_size), jnp.float32) * scale
    bv = jax.random.normal(keys[5], (emb_size,), jnp.float32) * 0.01
    wp = jax.random.normal(keys[6], (emb_size, emb_size), jnp.float32) * scale
    bp = jax.random.normal(keys[7], (emb_size,), jnp.float32) * 0.01
    return (wq, bq, wk, bk, wv, bv, wp, bp)


def msa_reference(x, params, *, num_heads):
    # Pure-JAX reference mirroring the PyTorch forward pass exactly.
    wq, bq, wk, bk, wv, bv, wp, bp = params
    B, N, E = x.shape
    D = E // num_heads

    def split_heads(t):  # 'b n (h d) -> b h n d'
        return t.reshape(B, N, num_heads, D).transpose(0, 2, 1, 3)

    q = split_heads(x @ wq + bq)
    k = split_heads(x @ wk + bk)
    v = split_heads(x @ wv + bv)
    score = jnp.einsum('bhqd,bhkd->bhqk', q, k)
    attention = jax.nn.softmax(score, axis=-1) / (E ** 0.5)
    out = jnp.einsum('bhal,bhlv->bhav', attention, v)
    out = out.transpose(0, 2, 1, 3).reshape(B, N, E)   # 'b h n d -> b n (h d)'
    return out @ wp + bp


if __name__ == "__main__":
    key = jax.random.PRNGKey(0)

    def run_case(B, N, E, H, matmul_dtype, tol):
        kx, kp = jax.random.split(jax.random.fold_in(key, N))
        x = jax.random.normal(kx, (B, N, E), jnp.float32)
        params = init_params(kp, E)
        out = jax.block_until_ready(
            msa_forward(x, params, num_heads=H, matmul_dtype=matmul_dtype))
        ref = msa_reference(x, params, num_heads=H)
        assert out.shape == ref.shape
        err = float(jnp.max(jnp.abs(out - ref)))
        # Tolerance accounts for TPU matmul precision differences (the XLA
        # reference itself uses default-precision MXU matmuls) and, in the
        # bf16 case, bf16 MXU operands; softmax is f32 in both.
        assert jnp.allclose(out, ref, atol=tol, rtol=tol), \
            (B, N, E, H, str(matmul_dtype), err)

    # Small shapes consistent with the module: batch=2, seq=8, emb=32, heads=8.
    run_case(2, 8, 32, 8, jnp.float32, 2e-2)    # f32-operand path
    run_case(2, 8, 32, 8, jnp.bfloat16, 4e-2)   # default bf16-MXU / f32-softmax
    run_case(2, 12, 32, 8, jnp.float32, 2e-2)   # exercises token padding + mask
    print("KERNEL_OK")
</pallas_src>

<mosaic_0001>
module attributes {stable_mosaic.version = 11 : i64} {
  func.func @_msa_kernel(%arg0: i32, %arg1: memref<1x8x32xf32, #tpu.memory_space<vmem>>, %arg2: memref<8x32x12xf32, #tpu.memory_space<vmem>>, %arg3: memref<8x1x12xf32, #tpu.memory_space<vmem>>, %arg4: memref<32x32xf32, #tpu.memory_space<vmem>>, %arg5: memref<1x32xf32, #tpu.memory_space<vmem>>, %arg6: memref<1x8x32xf32, #tpu.memory_space<vmem>>, %arg7: memref<8x32xf32, #tpu.memory_space<vmem>>) attributes {dimension_semantics = [#tpu.dimension_semantics<parallel>], iteration_bounds = array<i64: 2>, scalar_prefetch = 0 : i64, scratch_operands = 1 : i64, tpu.core_type = #tpu.core_type<tc>, window_params = [{transform_indices = @transform_0, window_bounds = array<i64: 1, 8, 32>}, {pipeline_mode = #tpu.pipeline_mode<synchronous>, transform_indices = @transform_1, window_bounds = array<i64: 8, 32, 12>}, {pipeline_mode = #tpu.pipeline_mode<synchronous>, transform_indices = @transform_2, window_bounds = array<i64: 8, 1, 12>}, {pipeline_mode = #tpu.pipeline_mode<synchronous>, transform_indices = @transform_3, window_bounds = array<i64: 32, 32>}, {pipeline_mode = #tpu.pipeline_mode<synchronous>, transform_indices = @transform_4, window_bounds = array<i64: 1, 32>}, {transform_indices = @transform_5, window_bounds = array<i64: 1, 8, 32>}]} {
    %c0 = arith.constant 0 : index
    %c0_0 = arith.constant 0 : index
    %c0_1 = arith.constant 0 : index
    %0 = vector.load %arg1[%c0, %c0_0, %c0_1] : memref<1x8x32xf32, #tpu.memory_space<vmem>>, vector<1x8x32xf32>
    %1 = vector.shape_cast %0 : vector<1x8x32xf32> to vector<8x32xf32>
    %c0_2 = arith.constant 0 : index
    %c0_3 = arith.constant 0 : index
    %c0_4 = arith.constant 0 : index
    %2 = vector.load %arg2[%c0_2, %c0_3, %c0_4] : memref<8x32x12xf32, #tpu.memory_space<vmem>>, vector<1x32x12xf32>
    %3 = vector.shape_cast %2 : vector<1x32x12xf32> to vector<32x12xf32>
    %c0_5 = arith.constant 0 : index
    %c0_6 = arith.constant 0 : index
    %c0_7 = arith.constant 0 : index
    %4 = vector.load %arg3[%c0_5, %c0_6, %c0_7] : memref<8x1x12xf32, #tpu.memory_space<vmem>>, vector<1x1x12xf32>
    %5 = vector.shape_cast %4 : vector<1x1x12xf32> to vector<1x12xf32>
    %cst = arith.constant dense<0.000000e+00> : vector<8x12xf32>
    %6 = tpu.matmul %1, %3, %cst {dimension_numbers = #tpu.dot_dimension_numbers<[1], [0], [0], [1], [0, 0, 1, 1], [], []>} : vector<8x32xf32>, vector<32x12xf32>, vector<8x12xf32> -> vector<8x12xf32>
    %7 = vector.broadcast %5 : vector<1x12xf32> to vector<8x12xf32>
    %8 = arith.addf %6, %7 : vector<8x12xf32>
    %9 = vector.extract_strided_slice %8 {offsets = [0, 0], sizes = [8, 4], strides = [1, 1]} : vector<8x12xf32> to vector<8x4xf32>
    %10 = vector.shape_cast %9 : vector<8x4xf32> to vector<1x8x4xf32>
    %11 = vector.extract_strided_slice %8 {offsets = [0, 4], sizes = [8, 4], strides = [1, 1]} : vector<8x12xf32> to vector<8x4xf32>
    %12 = vector.shape_cast %11 : vector<8x4xf32> to vector<1x8x4xf32>
    %13 = vector.extract_strided_slice %8 {offsets = [0, 8], sizes = [8, 4], strides = [1, 1]} : vector<8x12xf32> to vector<8x4xf32>
    %14 = vector.shape_cast %13 : vector<8x4xf32> to vector<1x8x4xf32>
    "tpu.trace_start"() <{level = 10 : i32, message = "bqd,bkd->bqk"}> : () -> ()
    %cst_8 = arith.constant dense<0.000000e+00> : vector<1x8x8xf32>
    %15 = tpu.matmul %10, %12, %cst_8 {dimension_numbers = #tpu.dot_dimension_numbers<[2], [2], [1], [1], [0, 0, 0, 1, 1, 1], [0], [0]>} : vector<1x8x4xf32>, vector<1x8x4xf32>, vector<1x8x8xf32> -> vector<1x8x8xf32>
    "tpu.trace_stop"() : () -> ()
    %cst_9 = arith.constant dense<0xFF800000> : vector<1x8xf32>
    %16 = vector.multi_reduction <maximumf>, %15, %cst_9 [2] : vector<1x8x8xf32> to vector<1x8xf32>
    %17 = vector.shape_cast %16 : vector<1x8xf32> to vector<1x8x1xf32>
    %18 = vector.broadcast %17 : vector<1x8x1xf32> to vector<1x8x8xf32>
    %19 = arith.subf %15, %18 : vector<1x8x8xf32>
    %20 = math.exp %19 : vector<1x8x8xf32>
    %cst_10 = arith.constant dense<0.000000e+00> : vector<1x8xf32>
    %21 = vector.multi_reduction <add>, %20, %cst_10 [2] : vector<1x8x8xf32> to vector<1x8xf32>
    %22 = vector.shape_cast %21 : vector<1x8xf32> to vector<1x8x1xf32>
    %23 = tpu.reciprocal %22 : vector<1x8x1xf32> -> vector<1x8x1xf32>
    %cst_11 = arith.constant 0.176776692 : f32
    %24 = vector.broadcast %cst_11 : f32 to vector<1x8x1xf32>
    %25 = arith.mulf %23, %24 : vector<1x8x1xf32>
    %26 = vector.broadcast %25 : vector<1x8x1xf32> to vector<1x8x8xf32>
    %27 = arith.mulf %20, %26 : vector<1x8x8xf32>
    "tpu.trace_start"() <{level = 10 : i32, message = "bqk,bkd->bqd"}> : () -> ()
    %cst_12 = arith.constant dense<0.000000e+00> : vector<1x8x4xf32>
    %28 = tpu.matmul %27, %14, %cst_12 {dimension_numbers = #tpu.dot_dimension_numbers<[2], [1], [1], [2], [0, 0, 0, 1, 1, 2], [0], [0]>} : vector<1x8x8xf32>, vector<1x8x4xf32>, vector<1x8x4xf32> -> vector<1x8x4xf32>
    "tpu.trace_stop"() : () -> ()
    %29 = vector.shape_cast %28 : vector<1x8x4xf32> to vector<8x4xf32>
    %c0_13 = arith.constant 0 : index
    %c0_14 = arith.constant 0 : index
    %30 = vector.load %arg7[%c0_13, %c0_14] : memref<8x32xf32, #tpu.memory_space<vmem>>, vector<8x4xf32>
    tpu.vector_store %arg7[%c0_13, %c0_14], %29 {strides = array<i32>} : memref<8x32xf32, #tpu.memory_space<vmem>>, vector<8x4xf32>,
    %c1 = arith.constant 1 : index
    %c0_15 = arith.constant 0 : index
    %c0_16 = arith.constant 0 : index
    %31 = vector.load %arg2[%c1, %c0_15, %c0_16] : memref<8x32x12xf32, #tpu.memory_space<vmem>>, vector<1x32x12xf32>
    %32 = vector.shape_cast %31 : vector<1x32x12xf32> to vector<32x12xf32>
    %c1_17 = arith.constant 1 : index
    %c0_18 = arith.constant 0 : index
    %c0_19 = arith.constant 0 : index
    %33 = vector.load %arg3[%c1_17, %c0_18, %c0_19] : memref<8x1x12xf32, #tpu.memory_space<vmem>>, vector<1x1x12xf32>
    %34 = vector.shape_cast %33 : vector<1x1x12xf32> to vector<1x12xf32>
    %cst_20 = arith.constant dense<0.000000e+00> : vector<8x12xf32>
    %35 = tpu.matmul %1, %32, %cst_20 {dimension_numbers = #tpu.dot_dimension_numbers<[1], [0], [0], [1], [0, 0, 1, 1], [], []>} : vector<8x32xf32>, vector<32x12xf32>, vector<8x12xf32> -> vector<8x12xf32>
    %36 = vector.broadcast %34 : vector<1x12xf32> to vector<8x12xf32>
    %37 = arith.addf %35, %36 : vector<8x12xf32>
    %38 = vector.extract_strided_slice %37 {offsets = [0, 0], sizes = [8, 4], strides = [1, 1]} : vector<8x12xf32> to vector<8x4xf32>
    %39 = vector.shape_cast %38 : vector<8x4xf32> to vector<1x8x4xf32>
    %40 = vector.extract_strided_slice %37 {offsets = [0, 4], sizes = [8, 4], strides = [1, 1]} : vector<8x12xf32> to vector<8x4xf32>
    %41 = vector.shape_cast %40 : vector<8x4xf32> to vector<1x8x4xf32>
    %42 = vector.extract_strided_slice %37 {offsets = [0, 8], sizes = [8, 4], strides = [1, 1]} : vector<8x12xf32> to vector<8x4xf32>
    %43 = vector.shape_cast %42 : vector<8x4xf32> to vector<1x8x4xf32>
    "tpu.trace_start"() <{level = 10 : i32, message = "bqd,bkd->bqk"}> : () -> ()
    %cst_21 = arith.constant dense<0.000000e+00> : vector<1x8x8xf32>
    %44 = tpu.matmul %39, %41, %cst_21 {dimension_numbers = #tpu.dot_dimension_numbers<[2], [2], [1], [1], [0, 0, 0, 1, 1, 1], [0], [0]>} : vector<1x8x4xf32>, vector<1x8x4xf32>, vector<1x8x8xf32> -> vector<1x8x8xf32>
    "tpu.trace_stop"() : () -> ()
    %cst_22 = arith.constant dense<0xFF800000> : vector<1x8xf32>
    %45 = vector.multi_reduction <maximumf>, %44, %cst_22 [2] : vector<1x8x8xf32> to vector<1x8xf32>
    %46 = vector.shape_cast %45 : vector<1x8xf32> to vector<1x8x1xf32>
    %47 = vector.broadcast %46 : vector<1x8x1xf32> to vector<1x8x8xf32>
    %48 = arith.subf %44, %47 : vector<1x8x8xf32>
    %49 = math.exp %48 : vector<1x8x8xf32>
    %cst_23 = arith.constant dense<0.000000e+00> : vector<1x8xf32>
    %50 = vector.multi_reduction <add>, %49, %cst_23 [2] : vector<1x8x8xf32> to vector<1x8xf32>
    %51 = vector.shape_cast %50 : vector<1x8xf32> to vector<1x8x1xf32>
    %52 = tpu.reciprocal %51 : vector<1x8x1xf32> -> vector<1x8x1xf32>
    %cst_24 = arith.constant 0.176776692 : f32
    %53 = vector.broadcast %cst_24 : f32 to vector<1x8x1xf32>
    %54 = arith.mulf %52, %53 : vector<1x8x1xf32>
    %55 = vector.broadcast %54 : vector<1x8x1xf32> to vector<1x8x8xf32>
    %56 = arith.mulf %49, %55 : vector<1x8x8xf32>
    "tpu.trace_start"() <{level = 10 : i32, message = "bqk,bkd->bqd"}> : () -> ()
    %cst_25 = arith.constant dense<0.000000e+00> : vector<1x8x4xf32>
    %57 = tpu.matmul %56, %43, %cst_25 {dimension_numbers = #tpu.dot_dimension_numbers<[2], [1], [1], [2], [0, 0, 0, 1, 1, 2], [0], [0]>} : vector<1x8x8xf32>, vector<1x8x4xf32>, vector<1x8x4xf32> -> vector<1x8x4xf32>
    "tpu.trace_stop"() : () -> ()
    %58 = vector.shape_cast %57 : vector<1x8x4xf32> to vector<8x4xf32>
    %c0_26 = arith.constant 0 : index
    %c4 = arith.constant 4 : index
    %59 = vector.load %arg7[%c0_26, %c4] : memref<8x32xf32, #tpu.memory_space<vmem>>, vector<8x4xf32>
    tpu.vector_store %arg7[%c0_26, %c4], %58 {strides = array<i32>} : memref<8x32xf32, #tpu.memory_space<vmem>>, vector<8x4xf32>,
    %c2 = arith.constant 2 : index
    %c0_27 = arith.constant 0 : index
    %c0_28 = arith.constant 0 : index
    %60 = vector.load %arg2[%c2, %c0_27, %c0_28] : memref<8x32x12xf32, #tpu.memory_space<vmem>>, vector<1x32x12xf32>
    %61 = vector.shape_cast %60 : vector<1x32x12xf32> to vector<32x12xf32>
    %c2_29 = arith.constant 2 : index
    %c0_30 = arith.constant 0 : index
    %c0_31 = arith.constant 0 : index
    %62 = vector.load %arg3[%c2_29, %c0_30, %c0_31] : memref<8x1x12xf32, #tpu.memory_space<vmem>>, vector<1x1x12xf32>
    %63 = vector.shape_cast %62 : vector<1x1x12xf32> to vector<1x12xf32>
    %cst_32 = arith.constant dense<0.000000e+00> : vector<8x12xf32>
    %64 = tpu.matmul %1, %61, %cst_32 {dimension_numbers = #tpu.dot_dimension_numbers<[1], [0], [0], [1], [0, 0, 1, 1], [], []>} : vector<8x32xf32>, vector<32x12xf32>, vector<8x12xf32> -> vector<8x12xf32>
    %65 = vector.broadcast %63 : vector<1x12xf32> to vector<8x12xf32>
    %66 = arith.addf %64, %65 : vector<8x12xf32>
    %67 = vector.extract_strided_slice %66 {offsets = [0, 0], sizes = [8, 4], strides = [1, 1]} : vector<8x12xf32> to vector<8x4xf32>
    %68 = vector.shape_cast %67 : vector<8x4xf32> to vector<1x8x4xf32>
    %69 = vector.extract_strided_slice %66 {offsets = [0, 4], sizes = [8, 4], strides = [1, 1]} : vector<8x12xf32> to vector<8x4xf32>
    %70 = vector.shape_cast %69 : vector<8x4xf32> to vector<1x8x4xf32>
    %71 = vector.extract_strided_slice %66 {offsets = [0, 8], sizes = [8, 4], strides = [1, 1]} : vector<8x12xf32> to vector<8x4xf32>
    %72 = vector.shape_cast %71 : vector<8x4xf32> to vector<1x8x4xf32>
    "tpu.trace_start"() <{level = 10 : i32, message = "bqd,bkd->bqk"}> : () -> ()
    %cst_33 = arith.constant dense<0.000000e+00> : vector<1x8x8xf32>
    %73 = tpu.matmul %68, %70, %cst_33 {dimension_numbers = #tpu.dot_dimension_numbers<[2], [2], [1], [1], [0, 0, 0, 1, 1, 1], [0], [0]>} : vector<1x8x4xf32>, vector<1x8x4xf32>, vector<1x8x8xf32> -> vector<1x8x8xf32>
    "tpu.trace_stop"() : () -> ()
    %cst_34 = arith.constant dense<0xFF800000> : vector<1x8xf32>
    %74 = vector.multi_reduction <maximumf>, %73, %cst_34 [2] : vector<1x8x8xf32> to vector<1x8xf32>
    %75 = vector.shape_cast %74 : vector<1x8xf32> to vector<1x8x1xf32>
    %76 = vector.broadcast %75 : vector<1x8x1xf32> to vector<1x8x8xf32>
    %77 = arith.subf %73, %76 : vector<1x8x8xf32>
    %78 = math.exp %77 : vector<1x8x8xf32>
    %cst_35 = arith.constant dense<0.000000e+00> : vector<1x8xf32>
    %79 = vector.multi_reduction <add>, %78, %cst_35 [2] : vector<1x8x8xf32> to vector<1x8xf32>
    %80 = vector.shape_cast %79 : vector<1x8xf32> to vector<1x8x1xf32>
    %81 = tpu.reciprocal %80 : vector<1x8x1xf32> -> vector<1x8x1xf32>
    %cst_36 = arith.constant 0.176776692 : f32
    %82 = vector.broadcast %cst_36 : f32 to vector<1x8x1xf32>
    %83 = arith.mulf %81, %82 : vector<1x8x1xf32>
    %84 = vector.broadcast %83 : vector<1x8x1xf32> to vector<1x8x8xf32>
    %85 = arith.mulf %78, %84 : vector<1x8x8xf32>
    "tpu.trace_start"() <{level = 10 : i32, message = "bqk,bkd->bqd"}> : () -> ()
    %cst_37 = arith.constant dense<0.000000e+00> : vector<1x8x4xf32>
    %86 = tpu.matmul %85, %72, %cst_37 {dimension_numbers = #tpu.dot_dimension_numbers<[2], [1], [1], [2], [0, 0, 0, 1, 1, 2], [0], [0]>} : vector<1x8x8xf32>, vector<1x8x4xf32>, vector<1x8x4xf32> -> vector<1x8x4xf32>
    "tpu.trace_stop"() : () -> ()
    %87 = vector.shape_cast %86 : vector<1x8x4xf32> to vector<8x4xf32>
    %c0_38 = arith.constant 0 : index
    %c8 = arith.constant 8 : index
    %88 = vector.load %arg7[%c0_38, %c8] : memref<8x32xf32, #tpu.memory_space<vmem>>, vector<8x4xf32>
    tpu.vector_store %arg7[%c0_38, %c8], %87 {strides = array<i32>} : memref<8x32xf32, #tpu.memory_space<vmem>>, vector<8x4xf32>,
    %c3 = arith.constant 3 : index
    %c0_39 = arith.constant 0 : index
    %c0_40 = arith.constant 0 : index
    %89 = vector.load %arg2[%c3, %c0_39, %c0_40] : memref<8x32x12xf32, #tpu.memory_space<vmem>>, vector<1x32x12xf32>
    %90 = vector.shape_cast %89 : vector<1x32x12xf32> to vector<32x12xf32>
    %c3_41 = arith.constant 3 : index
    %c0_42 = arith.constant 0 : index
    %c0_43 = arith.constant 0 : index
    %91 = vector.load %arg3[%c3_41, %c0_42, %c0_43] : memref<8x1x12xf32, #tpu.memory_space<vmem>>, vector<1x1x12xf32>
    %92 = vector.shape_cast %91 : vector<1x1x12xf32> to vector<1x12xf32>
    %cst_44 = arith.constant dense<0.000000e+00> : vector<8x12xf32>
    %93 = tpu.matmul %1, %90, %cst_44 {dimension_numbers = #tpu.dot_dimension_numbers<[1], [0], [0], [1], [0, 0, 1, 1], [], []>} : vector<8x32xf32>, vector<32x12xf32>, vector<8x12xf32> -> vector<8x12xf32>
    %94 = vector.broadcast %92 : vector<1x12xf32> to vector<8x12xf32>
    %95 = arith.addf %93, %94 : vector<8x12xf32>
    %96 = vector.extract_strided_slice %95 {offsets = [0, 0], sizes = [8, 4], strides = [1, 1]} : vector<8x12xf32> to vector<8x4xf32>
    %97 = vector.shape_cast %96 : vector<8x4xf32> to vector<1x8x4xf32>
    %98 = vector.extract_strided_slice %95 {offsets = [0, 4], sizes = [8, 4], strides = [1, 1]} : vector<8x12xf32> to vector<8x4xf32>
    %99 = vector.shape_cast %98 : vector<8x4xf32> to vector<1x8x4xf32>
    %100 = vector.extract_strided_slice %95 {offsets = [0, 8], sizes = [8, 4], strides = [1, 1]} : vector<8x12xf32> to vector<8x4xf32>
    %101 = vector.shape_cast %100 : vector<8x4xf32> to vector<1x8x4xf32>
    "tpu.trace_start"() <{level = 10 : i32, message = "bqd,bkd->bqk"}> : () -> ()
    %cst_45 = arith.constant dense<0.000000e+00> : vector<1x8x8xf32>
    %102 = tpu.matmul %97, %99, %cst_45 {dimension_numbers = #tpu.dot_dimension_numbers<[2], [2], [1], [1], [0, 0, 0, 1, 1, 1], [0], [0]>} : vector<1x8x4xf32>, vector<1x8x4xf32>, vector<1x8x8xf32> -> vector<1x8x8xf32>
    "tpu.trace_stop"() : () -> ()
    %cst_46 = arith.constant dense<0xFF800000> : vector<1x8xf32>
    %103 = vector.multi_reduction <maximumf>, %102, %cst_46 [2] : vector<1x8x8xf32> to vector<1x8xf32>
    %104 = vector.shape_cast %103 : vector<1x8xf32> to vector<1x8x1xf32>
    %105 = vector.broadcast %104 : vector<1x8x1xf32> to vector<1x8x8xf32>
    %106 = arith.subf %102, %105 : vector<1x8x8xf32>
    %107 = math.exp %106 : vector<1x8x8xf32>
    %cst_47 = arith.constant dense<0.000000e+00> : vector<1x8xf32>
    %108 = vector.multi_reduction <add>, %107, %cst_47 [2] : vector<1x8x8xf32> to vector<1x8xf32>
    %109 = vector.shape_cast %108 : vector<1x8xf32> to vector<1x8x1xf32>
    %110 = tpu.reciprocal %109 : vector<1x8x1xf32> -> vector<1x8x1xf32>
    %cst_48 = arith.constant 0.176776692 : f32
    %111 = vector.broadcast %cst_48 : f32 to vector<1x8x1xf32>
    %112 = arith.mulf %110, %111 : vector<1x8x1xf32>
    %113 = vector.broadcast %112 : vector<1x8x1xf32> to vector<1x8x8xf32>
    %114 = arith.mulf %107, %113 : vector<1x8x8xf32>
    "tpu.trace_start"() <{level = 10 : i32, message = "bqk,bkd->bqd"}> : () -> ()
    %cst_49 = arith.constant dense<0.000000e+00> : vector<1x8x4xf32>
    %115 = tpu.matmul %114, %101, %cst_49 {dimension_numbers = #tpu.dot_dimension_numbers<[2], [1], [1], [2], [0, 0, 0, 1, 1, 2], [0], [0]>} : vector<1x8x8xf32>, vector<1x8x4xf32>, vector<1x8x4xf32> -> vector<1x8x4xf32>
    "tpu.trace_stop"() : () -> ()
    %116 = vector.shape_cast %115 : vector<1x8x4xf32> to vector<8x4xf32>
    %c0_50 = arith.constant 0 : index
    %c12 = arith.constant 12 : index
    %117 = vector.load %arg7[%c0_50, %c12] : memref<8x32xf32, #tpu.memory_space<vmem>>, vector<8x4xf32>
    tpu.vector_store %arg7[%c0_50, %c12], %116 {strides = array<i32>} : memref<8x32xf32, #tpu.memory_space<vmem>>, vector<8x4xf32>,
    %c4_51 = arith.constant 4 : index
    %c0_52 = arith.constant 0 : index
    %c0_53 = arith.constant 0 : index
    %118 = vector.load %arg2[%c4_51, %c0_52, %c0_53] : memref<8x32x12xf32, #tpu.memory_space<vmem>>, vector<1x32x12xf32>
    %119 = vector.shape_cast %118 : vector<1x32x12xf32> to vector<32x12xf32>
    %c4_54 = arith.constant 4 : index
    %c0_55 = arith.constant 0 : index
    %c0_56 = arith.constant 0 : index
    %120 = vector.load %arg3[%c4_54, %c0_55, %c0_56] : memref<8x1x12xf32, #tpu.memory_space<vmem>>, vector<1x1x12xf32>
    %121 = vector.shape_cast %120 : vector<1x1x12xf32> to vector<1x12xf32>
    %cst_57 = arith.constant dense<0.000000e+00> : vector<8x12xf32>
    %122 = tpu.matmul %1, %119, %cst_57 {dimension_numbers = #tpu.dot_dimension_numbers<[1], [0], [0], [1], [0, 0, 1, 1], [], []>} : vector<8x32xf32>, vector<32x12xf32>, vector<8x12xf32> -> vector<8x12xf32>
    %123 = vector.broadcast %121 : vector<1x12xf32> to vector<8x12xf32>
    %124 = arith.addf %122, %123 : vector<8x12xf32>
    %125 = vector.extract_strided_slice %124 {offsets = [0, 0], sizes = [8, 4], strides = [1, 1]} : vector<8x12xf32> to vector<8x4xf32>
    %126 = vector.shape_cast %125 : vector<8x4xf32> to vector<1x8x4xf32>
    %127 = vector.extract_strided_slice %124 {offsets = [0, 4], sizes = [8, 4], strides = [1, 1]} : vector<8x12xf32> to vector<8x4xf32>
    %128 = vector.shape_cast %127 : vector<8x4xf32> to vector<1x8x4xf32>
    %129 = vector.extract_strided_slice %124 {offsets = [0, 8], sizes = [8, 4], strides = [1, 1]} : vector<8x12xf32> to vector<8x4xf32>
    %130 = vector.shape_cast %129 : vector<8x4xf32> to vector<1x8x4xf32>
    "tpu.trace_start"() <{level = 10 : i32, message = "bqd,bkd->bqk"}> : () -> ()
    %cst_58 = arith.constant dense<0.000000e+00> : vector<1x8x8xf32>
    %131 = tpu.matmul %126, %128, %cst_58 {dimension_numbers = #tpu.dot_dimension_numbers<[2], [2], [1], [1], [0, 0, 0, 1, 1, 1], [0], [0]>} : vector<1x8x4xf32>, vector<1x8x4xf32>, vector<1x8x8xf32> -> vector<1x8x8xf32>
    "tpu.trace_stop"() : () -> ()
    %cst_59 = arith.constant dense<0xFF800000> : vector<1x8xf32>
    %132 = vector.multi_reduction <maximumf>, %131, %cst_59 [2] : vector<1x8x8xf32> to vector<1x8xf32>
    %133 = vector.shape_cast %132 : vector<1x8xf32> to vector<1x8x1xf32>
    %134 = vector.broadcast %133 : vector<1x8x1xf32> to vector<1x8x8xf32>
    %135 = arith.subf %131, %134 : vector<1x8x8xf32>
    %136 = math.exp %135 : vector<1x8x8xf32>
    %cst_60 = arith.constant dense<0.000000e+00> : vector<1x8xf32>
    %137 = vector.multi_reduction <add>, %136, %cst_60 [2] : vector<1x8x8xf32> to vector<1x8xf32>
    %138 = vector.shape_cast %137 : vector<1x8xf32> to vector<1x8x1xf32>
    %139 = tpu.reciprocal %138 : vector<1x8x1xf32> -> vector<1x8x1xf32>
    %cst_61 = arith.constant 0.176776692 : f32
    %140 = vector.broadcast %cst_61 : f32 to vector<1x8x1xf32>
    %141 = arith.mulf %139, %140 : vector<1x8x1xf32>
    %142 = vector.broadcast %141 : vector<1x8x1xf32> to vector<1x8x8xf32>
    %143 = arith.mulf %136, %142 : vector<1x8x8xf32>
    "tpu.trace_start"() <{level = 10 : i32, message = "bqk,bkd->bqd"}> : () -> ()
    %cst_62 = arith.constant dense<0.000000e+00> : vector<1x8x4xf32>
    %144 = tpu.matmul %143, %130, %cst_62 {dimension_numbers = #tpu.dot_dimension_numbers<[2], [1], [1], [2], [0, 0, 0, 1, 1, 2], [0], [0]>} : vector<1x8x8xf32>, vector<1x8x4xf32>, vector<1x8x4xf32> -> vector<1x8x4xf32>
    "tpu.trace_stop"() : () -> ()
    %145 = vector.shape_cast %144 : vector<1x8x4xf32> to vector<8x4xf32>
    %c0_63 = arith.constant 0 : index
    %c16 = arith.constant 16 : index
    %146 = vector.load %arg7[%c0_63, %c16] : memref<8x32xf32, #tpu.memory_space<vmem>>, vector<8x4xf32>
    tpu.vector_store %arg7[%c0_63, %c16], %145 {strides = array<i32>} : memref<8x32xf32, #tpu.memory_space<vmem>>, vector<8x4xf32>,
    %c5 = arith.constant 5 : index
    %c0_64 = arith.constant 0 : index
    %c0_65 = arith.constant 0 : index
    %147 = vector.load %arg2[%c5, %c0_64, %c0_65] : memref<8x32x12xf32, #tpu.memory_space<vmem>>, vector<1x32x12xf32>
    %148 = vector.shape_cast %147 : vector<1x32x12xf32> to vector<32x12xf32>
    %c5_66 = arith.constant 5 : index
    %c0_67 = arith.constant 0 : index
    %c0_68 = arith.constant 0 : index
    %149 = vector.load %arg3[%c5_66, %c0_67, %c0_68] : memref<8x1x12xf32, #tpu.memory_space<vmem>>, vector<1x1x12xf32>
    %150 = vector.shape_cast %149 : vector<1x1x12xf32> to vector<1x12xf32>
    %cst_69 = arith.constant dense<0.000000e+00> : vector<8x12xf32>
    %151 = tpu.matmul %1, %148, %cst_69 {dimension_numbers = #tpu.dot_dimension_numbers<[1], [0], [0], [1], [0, 0, 1, 1], [], []>} : vector<8x32xf32>, vector<32x12xf32>, vector<8x12xf32> -> vector<8x12xf32>
    %152 = vector.broadcast %150 : vector<1x12xf32> to vector<8x12xf32>
    %153 = arith.addf %151, %152 : vector<8x12xf32>
    %154 = vector.extract_strided_slice %153 {offsets = [0, 0], sizes = [8, 4], strides = [1, 1]} : vector<8x12xf32> to vector<8x4xf32>
    %155 = vector.shape_cast %154 : vector<8x4xf32> to vector<1x8x4xf32>
    %156 = vector.extract_strided_slice %153 {offsets = [0, 4], sizes = [8, 4], strides = [1, 1]} : vector<8x12xf32> to vector<8x4xf32>
    %157 = vector.shape_cast %156 : vector<8x4xf32> to vector<1x8x4xf32>
    %158 = vector.extract_strided_slice %153 {offsets = [0, 8], sizes = [8, 4], strides = [1, 1]} : vector<8x12xf32> to vector<8x4xf32>
    %159 = vector.shape_cast %158 : vector<8x4xf32> to vector<1x8x4xf32>
    "tpu.trace_start"() <{level = 10 : i32, message = "bqd,bkd->bqk"}> : () -> ()
    %cst_70 = arith.constant dense<0.000000e+00> : vector<1x8x8xf32>
    %160 = tpu.matmul %155, %157, %cst_70 {dimension_numbers = #tpu.dot_dimension_numbers<[2], [2], [1], [1], [0, 0, 0, 1, 1, 1], [0], [0]>} : vector<1x8x4xf32>, vector<1x8x4xf32>, vector<1x8x8xf32> -> vector<1x8x8xf32>
    "tpu.trace_stop"() : () -> ()
    %cst_71 = arith.constant dense<0xFF800000> : vector<1x8xf32>
    %161 = vector.multi_reduction <maximumf>, %160, %cst_71 [2] : vector<1x8x8xf32> to vector<1x8xf32>
    %162 = vector.shape_cast %161 : vector<1x8xf32> to vector<1x8x1xf32>
    %163 = vector.broadcast %162 : vector<1x8x1xf32> to vector<1x8x8xf32>
    %164 = arith.subf %160, %163 : vector<1x8x8xf32>
    %165 = math.exp %164 : vector<1x8x8xf32>
    %cst_72 = arith.constant dense<0.000000e+00> : vector<1x8xf32>
    %166 = vector.multi_reduction <add>, %165, %cst_72 [2] : vector<1x8x8xf32> to vector<1x8xf32>
    %167 = vector.shape_cast %166 : vector<1x8xf32> to vector<1x8x1xf32>
    %168 = tpu.reciprocal %167 : vector<1x8x1xf32> -> vector<1x8x1xf32>
    %cst_73 = arith.constant 0.176776692 : f32
    %169 = vector.broadcast %cst_73 : f32 to vector<1x8x1xf32>
    %170 = arith.mulf %168, %169 : vector<1x8x1xf32>
    %171 = vector.broadcast %170 : vector<1x8x1xf32> to vector<1x8x8xf32>
    %172 = arith.mulf %165, %171 : vector<1x8x8xf32>
    "tpu.trace_start"() <{level = 10 : i32, message = "bqk,bkd->bqd"}> : () -> ()
    %cst_74 = arith.constant dense<0.000000e+00> : vector<1x8x4xf32>
    %173 = tpu.matmul %172, %159, %cst_74 {dimension_numbers = #tpu.dot_dimension_numbers<[2], [1], [1], [2], [0, 0, 0, 1, 1, 2], [0], [0]>} : vector<1x8x8xf32>, vector<1x8x4xf32>, vector<1x8x4xf32> -> vector<1x8x4xf32>
    "tpu.trace_stop"() : () -> ()
    %174 = vector.shape_cast %173 : vector<1x8x4xf32> to vector<8x4xf32>
    %c0_75 = arith.constant 0 : index
    %c20 = arith.constant 20 : index
    %175 = vector.load %arg7[%c0_75, %c20] : memref<8x32xf32, #tpu.memory_space<vmem>>, vector<8x4xf32>
    tpu.vector_store %arg7[%c0_75, %c20], %174 {strides = array<i32>} : memref<8x32xf32, #tpu.memory_space<vmem>>, vector<8x4xf32>,
    %c6 = arith.constant 6 : index
    %c0_76 = arith.constant 0 : index
    %c0_77 = arith.constant 0 : index
    %176 = vector.load %arg2[%c6, %c0_76, %c0_77] : memref<8x32x12xf32, #tpu.memory_space<vmem>>, vector<1x32x12xf32>
    %177 = vector.shape_cast %176 : vector<1x32x12xf32> to vector<32x12xf32>
    %c6_78 = arith.constant 6 : index
    %c0_79 = arith.constant 0 : index
    %c0_80 = arith.constant 0 : index
    %178 = vector.load %arg3[%c6_78, %c0_79, %c0_80] : memref<8x1x12xf32, #tpu.memory_space<vmem>>, vector<1x1x12xf32>
    %179 = vector.shape_cast %178 : vector<1x1x12xf32> to vector<1x12xf32>
    %cst_81 = arith.constant dense<0.000000e+00> : vector<8x12xf32>
    %180 = tpu.matmul %1, %177, %cst_81 {dimension_numbers = #tpu.dot_dimension_numbers<[1], [0], [0], [1], [0, 0, 1, 1], [], []>} : vector<8x32xf32>, vector<32x12xf32>, vector<8x12xf32> -> vector<8x12xf32>
    %181 = vector.broadcast %179 : vector<1x12xf32> to vector<8x12xf32>
    %182 = arith.addf %180, %181 : vector<8x12xf32>
    %183 = vector.extract_strided_slice %182 {offsets = [0, 0], sizes = [8, 4], strides = [1, 1]} : vector<8x12xf32> to vector<8x4xf32>
    %184 = vector.shape_cast %183 : vector<8x4xf32> to vector<1x8x4xf32>
    %185 = vector.extract_strided_slice %182 {offsets = [0, 4], sizes = [8, 4], strides = [1, 1]} : vector<8x12xf32> to vector<8x4xf32>
    %186 = vector.shape_cast %185 : vector<8x4xf32> to vector<1x8x4xf32>
    %187 = vector.extract_strided_slice %182 {offsets = [0, 8], sizes = [8, 4], strides = [1, 1]} : vector<8x12xf32> to vector<8x4xf32>
    %188 = vector.shape_cast %187 : vector<8x4xf32> to vector<1x8x4xf32>
    "tpu.trace_start"() <{level = 10 : i32, message = "bqd,bkd->bqk"}> : () -> ()
    %cst_82 = arith.constant dense<0.000000e+00> : vector<1x8x8xf32>
    %189 = tpu.matmul %184, %186, %cst_82 {dimension_numbers = #tpu.dot_dimension_numbers<[2], [2], [1], [1], [0, 0, 0, 1, 1, 1], [0], [0]>} : vector<1x8x4xf32>, vector<1x8x4xf32>, vector<1x8x8xf32> -> vector<1x8x8xf32>
    "tpu.trace_stop"() : () -> ()
    %cst_83 = arith.constant dense<0xFF800000> : vector<1x8xf32>
    %190 = vector.multi_reduction <maximumf>, %189, %cst_83 [2] : vector<1x8x8xf32> to vector<1x8xf32>
    %191 = vector.shape_cast %190 : vector<1x8xf32> to vector<1x8x1xf32>
    %192 = vector.broadcast %191 : vector<1x8x1xf32> to vector<1x8x8xf32>
    %193 = arith.subf %189, %192 : vector<1x8x8xf32>
    %194 = math.exp %193 : vector<1x8x8xf32>
    %cst_84 = arith.constant dense<0.000000e+00> : vector<1x8xf32>
    %195 = vector.multi_reduction <add>, %194, %cst_84 [2] : vector<1x8x8xf32> to vector<1x8xf32>
    %196 = vector.shape_cast %195 : vector<1x8xf32> to vector<1x8x1xf32>
    %197 = tpu.reciprocal %196 : vector<1x8x1xf32> -> vector<1x8x1xf32>
    %cst_85 = arith.constant 0.176776692 : f32
    %198 = vector.broadcast %cst_85 : f32 to vector<1x8x1xf32>
    %199 = arith.mulf %197, %198 : vector<1x8x1xf32>
    %200 = vector.broadcast %199 : vector<1x8x1xf32> to vector<1x8x8xf32>
    %201 = arith.mulf %194, %200 : vector<1x8x8xf32>
    "tpu.trace_start"() <{level = 10 : i32, message = "bqk,bkd->bqd"}> : () -> ()
    %cst_86 = arith.constant dense<0.000000e+00> : vector<1x8x4xf32>
    %202 = tpu.matmul %201, %188, %cst_86 {dimension_numbers = #tpu.dot_dimension_numbers<[2], [1], [1], [2], [0, 0, 0, 1, 1, 2], [0], [0]>} : vector<1x8x8xf32>, vector<1x8x4xf32>, vector<1x8x4xf32> -> vector<1x8x4xf32>
    "tpu.trace_stop"() : () -> ()
    %203 = vector.shape_cast %202 : vector<1x8x4xf32> to vector<8x4xf32>
    %c0_87 = arith.constant 0 : index
    %c24 = arith.constant 24 : index
    %204 = vector.load %arg7[%c0_87, %c24] : memref<8x32xf32, #tpu.memory_space<vmem>>, vector<8x4xf32>
    tpu.vector_store %arg7[%c0_87, %c24], %203 {strides = array<i32>} : memref<8x32xf32, #tpu.memory_space<vmem>>, vector<8x4xf32>,
    %c7 = arith.constant 7 : index
    %c0_88 = arith.constant 0 : index
    %c0_89 = arith.constant 0 : index
    %205 = vector.load %arg2[%c7, %c0_88, %c0_89] : memref<8x32x12xf32, #tpu.memory_space<vmem>>, vector<1x32x12xf32>
    %206 = vector.shape_cast %205 : vector<1x32x12xf32> to vector<32x12xf32>
    %c7_90 = arith.constant 7 : index
    %c0_91 = arith.constant 0 : index
    %c0_92 = arith.constant 0 : index
    %207 = vector.load %arg3[%c7_90, %c0_91, %c0_92] : memref<8x1x12xf32, #tpu.memory_space<vmem>>, vector<1x1x12xf32>
    %208 = vector.shape_cast %207 : vector<1x1x12xf32> to vector<1x12xf32>
    %cst_93 = arith.constant dense<0.000000e+00> : vector<8x12xf32>
    %209 = tpu.matmul %1, %206, %cst_93 {dimension_numbers = #tpu.dot_dimension_numbers<[1], [0], [0], [1], [0, 0, 1, 1], [], []>} : vector<8x32xf32>, vector<32x12xf32>, vector<8x12xf32> -> vector<8x12xf32>
    %210 = vector.broadcast %208 : vector<1x12xf32> to vector<8x12xf32>
    %211 = arith.addf %209, %210 : vector<8x12xf32>
    %212 = vector.extract_strided_slice %211 {offsets = [0, 0], sizes = [8, 4], strides = [1, 1]} : vector<8x12xf32> to vector<8x4xf32>
    %213 = vector.shape_cast %212 : vector<8x4xf32> to vector<1x8x4xf32>
    %214 = vector.extract_strided_slice %211 {offsets = [0, 4], sizes = [8, 4], strides = [1, 1]} : vector<8x12xf32> to vector<8x4xf32>
    %215 = vector.shape_cast %214 : vector<8x4xf32> to vector<1x8x4xf32>
    %216 = vector.extract_strided_slice %211 {offsets = [0, 8], sizes = [8, 4], strides = [1, 1]} : vector<8x12xf32> to vector<8x4xf32>
    %217 = vector.shape_cast %216 : vector<8x4xf32> to vector<1x8x4xf32>
    "tpu.trace_start"() <{level = 10 : i32, message = "bqd,bkd->bqk"}> : () -> ()
    %cst_94 = arith.constant dense<0.000000e+00> : vector<1x8x8xf32>
    %218 = tpu.matmul %213, %215, %cst_94 {dimension_numbers = #tpu.dot_dimension_numbers<[2], [2], [1], [1], [0, 0, 0, 1, 1, 1], [0], [0]>} : vector<1x8x4xf32>, vector<1x8x4xf32>, vector<1x8x8xf32> -> vector<1x8x8xf32>
    "tpu.trace_stop"() : () -> ()
    %cst_95 = arith.constant dense<0xFF800000> : vector<1x8xf32>
    %219 = vector.multi_reduction <maximumf>, %218, %cst_95 [2] : vector<1x8x8xf32> to vector<1x8xf32>
    %220 = vector.shape_cast %219 : vector<1x8xf32> to vector<1x8x1xf32>
    %221 = vector.broadcast %220 : vector<1x8x1xf32> to vector<1x8x8xf32>
    %222 = arith.subf %218, %221 : vector<1x8x8xf32>
    %223 = math.exp %222 : vector<1x8x8xf32>
    %cst_96 = arith.constant dense<0.000000e+00> : vector<1x8xf32>
    %224 = vector.multi_reduction <add>, %223, %cst_96 [2] : vector<1x8x8xf32> to vector<1x8xf32>
    %225 = vector.shape_cast %224 : vector<1x8xf32> to vector<1x8x1xf32>
    %226 = tpu.reciprocal %225 : vector<1x8x1xf32> -> vector<1x8x1xf32>
    %cst_97 = arith.constant 0.176776692 : f32
    %227 = vector.broadcast %cst_97 : f32 to vector<1x8x1xf32>
    %228 = arith.mulf %226, %227 : vector<1x8x1xf32>
    %229 = vector.broadcast %228 : vector<1x8x1xf32> to vector<1x8x8xf32>
    %230 = arith.mulf %223, %229 : vector<1x8x8xf32>
    "tpu.trace_start"() <{level = 10 : i32, message = "bqk,bkd->bqd"}> : () -> ()
    %cst_98 = arith.constant dense<0.000000e+00> : vector<1x8x4xf32>
    %231 = tpu.matmul %230, %217, %cst_98 {dimension_numbers = #tpu.dot_dimension_numbers<[2], [1], [1], [2], [0, 0, 0, 1, 1, 2], [0], [0]>} : vector<1x8x8xf32>, vector<1x8x4xf32>, vector<1x8x4xf32> -> vector<1x8x4xf32>
    "tpu.trace_stop"() : () -> ()
    %232 = vector.shape_cast %231 : vector<1x8x4xf32> to vector<8x4xf32>
    %c0_99 = arith.constant 0 : index
    %c28 = arith.constant 28 : index
    %233 = vector.load %arg7[%c0_99, %c28] : memref<8x32xf32, #tpu.memory_space<vmem>>, vector<8x4xf32>
    tpu.vector_store %arg7[%c0_99, %c28], %232 {strides = array<i32>} : memref<8x32xf32, #tpu.memory_space<vmem>>, vector<8x4xf32>,
    %c0_100 = arith.constant 0 : index
    %c0_101 = arith.constant 0 : index
    %234 = vector.load %arg7[%c0_100, %c0_101] : memref<8x32xf32, #tpu.memory_space<vmem>>, vector<8x32xf32>
    %c0_102 = arith.constant 0 : index
    %c0_103 = arith.constant 0 : index
    %235 = vector.load %arg4[%c0_102, %c0_103] : memref<32x32xf32, #tpu.memory_space<vmem>>, vector<32x32xf32>
    %cst_104 = arith.constant dense<0.000000e+00> : vector<8x32xf32>
    %236 = tpu.matmul %234, %235, %cst_104 {dimension_numbers = #tpu.dot_dimension_numbers<[1], [0], [0], [1], [0, 0, 1, 1], [], []>} : vector<8x32xf32>, vector<32x32xf32>, vector<8x32xf32> -> vector<8x32xf32>
    %c0_105 = arith.constant 0 : index
    %c0_106 = arith.constant 0 : index
    %237 = vector.load %arg5[%c0_105, %c0_106] : memref<1x32xf32, #tpu.memory_space<vmem>>, vector<1x32xf32>
    %238 = vector.broadcast %237 : vector<1x32xf32> to vector<8x32xf32>
    %239 = arith.addf %236, %238 : vector<8x32xf32>
    %240 = vector.shape_cast %239 : vector<8x32xf32> to vector<1x8x32xf32>
    %c0_107 = arith.constant 0 : index
    %c0_108 = arith.constant 0 : index
    %c0_109 = arith.constant 0 : index
    %241 = vector.load %arg6[%c0_107, %c0_108, %c0_109] : memref<1x8x32xf32, #tpu.memory_space<vmem>>, vector<1x8x32xf32>
    tpu.vector_store %arg6[%c0_107, %c0_108, %c0_109], %240 {strides = array<i32>} : memref<1x8x32xf32, #tpu.memory_space<vmem>>, vector<1x8x32xf32>,
    return
  }
  func.func @transform_0(%arg0: i32) -> (i32, i32, i32) {
    %c0_i32 = arith.constant 0 : i32
    %c0_i32_0 = arith.constant 0 : i32
    %c0_i32_1 = arith.constant 0 : i32
    return %arg0, %c0_i32, %c0_i32_0 : i32, i32, i32
  }
  func.func @transform_1(%arg0: i32) -> (i32, i32, i32) {
    %c0_i32 = arith.constant 0 : i32
    %c0_i32_0 = arith.constant 0 : i32
    %c0_i32_1 = arith.constant 0 : i32
    %c0_i32_2 = arith.constant 0 : i32
    return %c0_i32, %c0_i32_0, %c0_i32_1 : i32, i32, i32
  }
  func.func @transform_2(%arg0: i32) -> (i32, i32, i32) {
    %c0_i32 = arith.constant 0 : i32
    %c0_i32_0 = arith.constant 0 : i32
    %c0_i32_1 = arith.constant 0 : i32
    %c0_i32_2 = arith.constant 0 : i32
    return %c0_i32, %c0_i32_0, %c0_i32_1 : i32, i32, i32
  }
  func.func @transform_3(%arg0: i32) -> (i32, i32) {
    %c0_i32 = arith.constant 0 : i32
    %c0_i32_0 = arith.constant 0 : i32
    %c0_i32_1 = arith.constant 0 : i32
    return %c0_i32, %c0_i32_0 : i32, i32
  }
  func.func @transform_4(%arg0: i32) -> (i32, i32) {
    %c0_i32 = arith.constant 0 : i32
    %c0_i32_0 = arith.constant 0 : i32
    %c0_i32_1 = arith.constant 0 : i32
    return %c0_i32, %c0_i32_0 : i32, i32
  }
  func.func @transform_5(%arg0: i32) -> (i32, i32, i32) {
    %c0_i32 = arith.constant 0 : i32
    %c0_i32_0 = arith.constant 0 : i32
    %c0_i32_1 = arith.constant 0 : i32
    return %arg0, %c0_i32, %c0_i32_0 : i32, i32, i32
  }
}

</mosaic_0001>

<bundles_post_ra>
// kernel: tpu_custom_call.1
= control target key start
LH: loop header
LB: loop body
LE: loop exit
PB: predicated region body
PF: predicated region fallthrough
CT: control target
= control target key end

     0   :  { %10 = vsyncpa [#allocation4], 0  ;;  %s3359_s0 = inlined_call_operand.vmem [shape: f32[2,8,32], index: 0, kind: input, shape index: {}]   ;;  %s3360_s1 = inlined_call_operand.vmem [shape: f32[8,32,12], index: 1, kind: input, shape index: {}]   ;;  %s3361_s2 = inlined_call_operand.vmem [shape: f32[8,1,12], index: 2, kind: input, shape index: {}]   ;;  %s3362_s3 = inlined_call_operand.vmem [shape: f32[32,32], index: 3, kind: input, shape index: {}]   ;;  %s3363_s4 = inlined_call_operand.vmem [shape: f32[1,32], index: 4, kind: input, shape index: {}]   ;;  %s3364_s5 = inlined_call_operand.hbm [shape: f32[2,8,32], index: 5, kind: output, shape index: {}]  }
   0x1   :  { %12 = vsyncpa [#allocation4 + $0x1], 0  ;;  %s2940_s18 = smov 0   ;;  %s2942_s19 = smov 0  }
   0x2   :  { %s2944_s20 = smov 0   ;;  %s2946_s21 = smov 0  }
   0x3 LB: > { %s2961_s22 = sadd.s32 4294967295, %s2896_s21   ;;  %s2411_s23 = sadd.s32 4294967294, %s2896_s21   ;;  %s2896_s21 = sphi %s2946_s21, %s3370_s21   ;;  %s2892_s20 = sphi %s2944_s20, %s3369_s20   ;;  %s2888_s19 = sphi %s2942_s19, %s3368_s19   ;;  %s2884_s18 = sphi %s2940_s18, %s3367_s18  }
   0x4   : > { %s2965_s24 = sadd.s32 1, %s2896_s21   ;;  %s135_s25 = sadd.s32 1, %s2892_s20 }
   0x5   : > { %s132_s26 = ssub.s32 %s2896_s21, %s2965_s24  ;;  %p145_p0 = scmp.ne.s32.totalorder %s2892_s20, %s2888_s19 }
   0x6   : > { %p133_p1 = scmp.eq.s32.totalorder %s132_s26, 0  ;;  %p146_p2 = scmp.eq.s32.totalorder %s2961_s22, 1 }
   0x7   : > { %p151_p3 = scmp.ne.s32.totalorder %s2888_s19, %s2884_s18  ;;  %p152_p4 = scmp.eq.s32.totalorder %s2411_s23, 1 }
   0x8   : > { %s2976_s27 = scalar_select %p133_p1, %s2892_s20, %s135_s25  }
   0x9   : > { %p2978_p5 = por %p146_p2, %p145_p0  ;;  %p2982_p6 = por %p152_p4, %p151_p3 }
   0xa   : > { %p2414_p7 = scmp.ge.s32.totalorder %s2896_s21, 1  ;;  %p189_p8 = scmp.lt.s32.totalorder %s2896_s21, 3 }
   0xc   : > { %p190_p9 = pnand %p2414_p7, %p189_p8 }
   0xd   : > { %p216_p10 = scmp.lt.s32.totalorder (!%p190_p9), %s2961_s22, 1  ;;  %s2900_s8 = smov (!%p190_p9), 120  }
   0xe   : > { %193 = sbr.rel (%p190_p9) target bundleno = 4949 (0x1355), region = 40  ;;  %s2903_s26 = smov (!%p190_p9), 4  }
   0xf   : > { %s2904_s30 = smov (!%p190_p9), 12   ;;  %s2905_s6 = smov (!%p190_p9), 16  }
  0x10   : > { %s2906_s7 = smov (!%p190_p9), 20   ;;  %s2907_s10 = smov (!%p190_p9), 24  }
  0x11   : > { %s2908_s23 = smov (!%p190_p9), 28   ;;  %s213_s25 = sand.u32 (!%p190_p9), 1, %s2888_s19  }
  0x12   : > { %s2339_s13 = scalar_lea.sflag (!%p190_p9), [#allocation4], %s213_s25 }
  0x13   : > { %v224_v0 = vld [vmem:[%s3360_s1 + $0x18] sm:$0xff]  ;;  %v2898_v1 = vmov 0.0   ;;  %v223_v2 = vld [vmem:[%s3360_s1 + $0x10] sm:$0xff]  ;;  %vm2899_vm0 = vmmov 0   ;;  %s217_s9 = scalar_select %p216_p10, %s2961_s22, 1  ;;  %v222_v3 = vld [vmem:[%s3360_s1 + $0x8] sm:$0xff] }
  0x14   : > { %2575 = vmatprep.subr.mxu0 %v2898_v1  ;;  %2583 = vmatprep.mubr.msk.f32.mxu0 %vm2899_vm0, %v2898_v1  ;;  %v221_v4 = vld [vmem:[%s3360_s1] sm:$0xff]  ;;  %vm232_vm1 = vcmask 261120   ;;  %v2425_v6 = vld [vmem:[%s3360_s1 + $0x38] sm:$0xff]  ;;  %v2424_v7 = vld [vmem:[%s3360_s1 + $0x30] sm:$0xff]  ;;  %vm309_vm2 = vcmask 31744   ;;  %vm384_vm3 = vcmask 64512  }
  0x15   : > { %2576 = vmatpush3.msra.mxu0 %v224_v0  ;;  %2586 = vmatprep.subr.mxu1 %v2898_v1  ;;  %s2416_s12 = sshll.u32 %s217_s9, 3  ;;  %v2417_v8 = vld [vmem:[%s3361_s2] ss:$0 sm:$0xff]  ;;  %s2901_s9 = smov 124   ;;  %v2423_v14 = vld [vmem:[%s3360_s1 + $0x28] sm:$0xff]  ;;  %v2435_v34 = vld [vmem:[%s3360_s1 + $0x58] sm:$0xff] }
  0x16   : > { %2577 = vmatprep.subr.mxu0 %v2898_v1  ;;  %2588 = vmatprep.mubr.msk.f32.mxu1 %vm2899_vm0, %v2898_v1  ;;  %s219_s17 = scalar_lea.vmem %s3359_s0, %s2416_s12  ;;  %v2422_v15 = vld [vmem:[%s3360_s1 + $0x20] sm:$0xff]  ;;  %v2434_v35 = vld [vmem:[%s3360_s1 + $0x50] sm:$0xff]  ;;  %v2433_v36 = vld [vmem:[%s3360_s1 + $0x48] sm:$0xff]  ;;  %vm726_vm4 = vcmask 64544   ;;  %vm980_vm5 = vcmask 97344   ;;  %vm1234_vm6 = vcmask 130144  }
  0x17   : > { %2578 = vmatpush3.msra.mxu0 %v223_v2  ;;  %v3013_v5 = vld [vmem:[%s219_s17] sm:$0xff]  ;;  %v2445_v57 = vld [vmem:[%s3360_s1 + $0x78] sm:$0xff]  ;;  %v2444_v58 = vld [vmem:[%s3360_s1 + $0x70] sm:$0xff]  ;;  %vm1488_vm7 = vcmask 162944   ;;  %vm1742_vm8 = vcmask 195744   ;;  %vm1996_vm9 = vcmask 228544  }
  0x18   : > { %2579 = vmatprep.subr.mxu0 %v2898_v1  ;;  %v2427_v19 = vld [vmem:[%s3361_s2 + $0x1] ss:$0 sm:$0xff]  ;;  %v2437_v50 = vld [vmem:[%s3361_s2 + $0x2] ss:$0 sm:$0xff]  ;;  %v2443_v59 = vld [vmem:[%s3360_s1 + $0x68] sm:$0xff]  ;;  %vm2250_vm10 = vcmask 261344  }
  0x19   : > { %2580 = vmatpush3.msra.mxu0 %v222_v3  ;;  %v2432_v37 = vld [vmem:[%s3360_s1 + $0x40] sm:$0xff] }
  0x1a   : > { %2581 = vmatprep.subr.mxu0 %v2898_v1  ;;  %v2442_v60 = vld [vmem:[%s3360_s1 + $0x60] sm:$0xff] }
  0x1b   : > { %2582 = vmatpush3.msra.mxu0 %v221_v4  ;;  %v2447_v3 = vld [vmem:[%s3361_s2 + $0x3] ss:$0 sm:$0xff] }
  0x1c   : > { %2584 = vmatmul.mubr.msk.f32.vlgmr.msra.gmra.mxu0 %vm232_vm1, %v3013_v5  ;;  %2596 = vmatprep.subr.mxu0 %v2898_v1 }
  0x1d   : > { %2604 = vmatprep.mubr.msk.f32.mxu0 %vm2899_vm0, %v2898_v1  ;;  %2597 = vmatpush3.msra.mxu0 %v2425_v6 }
  0x1e   : > { %2598 = vmatprep.subr.mxu0 %v2898_v1 }
  0x1f   : > { %2599 = vmatpush3.msra.mxu0 %v2424_v7 }
  0x20   : > { %2600 = vmatprep.subr.mxu0 %v2898_v1 }
  0x21   : > { %2601 = vmatpush3.msra.mxu0 %v2423_v14 }
  0x22   : > { %2602 = vmatprep.subr.mxu0 %v2898_v1 }
  0x23   : > { %2603 = vmatpush3.msra.mxu0 %v2422_v15 }
  0x24   : > { %2605 = vmatmul.mubr.msk.f32.vlgmr.msra.gmra.mxu0 %vm232_vm1, %v3013_v5  ;;  %2617 = vmatprep.subr.mxu0 %v2898_v1 }
  0x25   : > { %2625 = vmatprep.mubr.msk.f32.mxu0 %vm2899_vm0, %v2898_v1  ;;  %2618 = vmatpush3.msra.mxu0 %v2435_v34 }
  0x26   : > { %2619 = vmatprep.subr.mxu0 %v2898_v1 }
  0x27   : > { %2620 = vmatpush3.msra.mxu0 %v2434_v35 }
  0x28   : > { %2621 = vmatprep.subr.mxu0 %v2898_v1 }
  0x29   : > { %2622 = vmatpush3.msra.mxu0 %v2433_v36  ;;  %v2457_v36 = vld [vmem:[%s3361_s2 + $0x4] ss:$0 sm:$0xff] }
  0x2a   : > { %2623 = vmatprep.subr.mxu0 %v2898_v1 }
  0x2b   : > { %2624 = vmatpush3.msra.mxu0 %v2432_v37 }
  0x2c   : > { %2626 = vmatmul.mubr.msk.f32.vlgmr.msra.gmra.mxu0 %vm232_vm1, %v3013_v5  ;;  %2638 = vmatprep.subr.mxu0 %v2898_v1 }
  0x2d   : > { %2646 = vmatprep.mubr.msk.f32.mxu0 %vm2899_vm0, %v2898_v1  ;;  %2639 = vmatpush3.msra.mxu0 %v2445_v57 }
  0x2e   : > { %2640 = vmatprep.subr.mxu0 %v2898_v1 }
  0x2f   : > { %2641 = vmatpush3.msra.mxu0 %v2444_v58 }
  0x30   : > { %2642 = vmatprep.subr.mxu0 %v2898_v1 }
  0x31   : > { %2643 = vmatpush3.msra.mxu0 %v2443_v59 }
  0x32   : > { %2644 = vmatprep.subr.mxu0 %v2898_v1 }
  0x33   : > { %2645 = vmatpush3.msra.mxu0 %v2442_v60 }
  0x34   : > { %2647 = vmatmul.mubr.msk.f32.vlgmr.msra.gmra.mxu0 %vm232_vm1, %v3013_v5  ;;  %2659 = vmatprep.subr.mxu0 %v2898_v1 }
  0x35   : > { %2667 = vmatprep.mubr.msk.f32.mxu0 %vm2899_vm0, %v2898_v1 }
  0xdc   : > { %v302_v9 = vpop.f32.mrf.mxu0 }
  0xdd   : > { %v303_v10 = vadd.f32 %v2417_v8, %v302_v9 }
  0xde   : > { %v2585_v11 = vpop.f32.mrf.mxu0 }
  0xdf   : > { %397 = vrot.lane.b32.xlu1 %v303_v10, %s2900_s8  ;;  %307 = vrot.lane.b32.xlu0 %v303_v10, %s2901_s9 }
  0xe4   : > { %v553_v20 = vpop.f32.mrf.mxu0 }
  0xe5   : > { %v554_v21 = vadd.f32 %v2427_v19, %v553_v20  ;;  %v2455_v20 = vld [vmem:[%s3360_s1 + $0x98] sm:$0xff] }
  0xe6   : > { %v2606_v22 = vpop.f32.mrf.mxu0  ;;  %2660 = vmatpush3.msra.mxu0 %v2455_v20 }
  0xe7   : > { %2661 = vmatprep.subr.mxu0 %v2898_v1  ;;  %v2453_v22 = vld [vmem:[%s3360_s1 + $0x88] sm:$0xff] }
  0xec   : > { %v807_v43 = vpop.f32.mrf.mxu0 }
  0xed   : > { %v808_v51 = vadd.f32 %v2437_v50, %v807_v43  ;;  %v2465_v43 = vld [vmem:[%s3360_s1 + $0xb8] sm:$0xff] }
  0xee   : > { %v2627_v44 = vpop.f32.mrf.mxu0 }
  0xef   : > { %v2464_v44 = vld [vmem:[%s3360_s1 + $0xb0] sm:$0xff] }
  0xf4   : > { %v1061_v4 = vpop.f32.mrf.mxu0 }
  0xf5   : > { %v1062_v6 = vadd.f32 %v2447_v3, %v1061_v4 }
  0xf6   : > { %v2648_v7 = vpop.f32.mrf.mxu0 }
  0xf7   : > { %v2475_v7 = vld [vmem:[%s3360_s1 + $0xd8] sm:$0xff] }
 0x151   : > { %v308_v12 = vpop.permute.xlu0 %307  ;;  %v398_v13 = vpop.permute.xlu1 %397 }
 0x152   : > { %2587 = vmatpush3.xpose.msk.msra.mxu1 %vm309_vm2, %v308_v12 }
 0x153   : > { %2591 = vmatprep.subr.mxu1 %v2898_v1 }
 0x155   : > { %2589 = vmatmul.mubr.msk.f32.vlgmr.msra.gmra.mxu1 %vm309_vm2, %v303_v10 }
 0x156   : > { %2592 = vmatpush3.msra.mxu1 %v398_v13  ;;  %2593 = vmatprep.mubr.msk.f32.mxu1 %vm2899_vm0, %v2898_v1 }
 0x157   : > { %2607 = vmatprep.subr.mxu1 %v2898_v1 }
 0x215   : > { %v380_v16 = vpop.f32.mrf.mxu1 }
 0x216   : > { %v385_v17 = vsel %vm384_vm3, %v380_v16, -inf }
 0x217   : > { %386 = vmax.xlane.f32.xlu0 %v385_v17  ;;  %v2590_v18 = vpop.f32.mrf.mxu1 }
 0x22d   : > { %646 = vrot.lane.b32.xlu0 %v554_v21, %s2900_s8 }
 0x2a0   : > { %v387_v23 = vpop.xlane.xlu0 %386 }
 0x2a1   : > { %v388_v24 = vsub.f32 %v380_v16, %v387_v23  ;;  %v2452_v23 = vld [vmem:[%s3360_s1 + $0x80] sm:$0xff] }
 0x2a3   : > { %v389_v25 = vmul.f32 1.442695, %v388_v24 }
 0x2a4   : > { %v647_v33 = vpop.permute.xlu0 %646 }
 0x2a5   : > { %2804 = vpow2.f32 %v389_v25 }
 0x2b2   : > { %v2805_v26 = vpop.eup %2804 }
 0x2b3   : > { %v391_v27 = vsel %vm384_vm3, %v2805_v26, 0.0 }
 0x2b4   : > { %392 = vadd.xlane.f32.xlu1 %v391_v27 }
 0x2c5   : > { %558 = vrot.lane.b32.xlu1 %v554_v21, %s2901_s9 }
 0x33d   : > { %v393_v28 = vpop.xlane.xlu1 %392 }
 0x33e   : > { %2806 = vrcp.f32 %v393_v28 }
 0x341   : > { %v559_v32 = vpop.permute.xlu1 %558 }
 0x34b   : > { %v2807_v29 = vpop.eup %2806 }
 0x34c   : > { %v395_v30 = vmul.f32 0.17677669, %v2807_v29 }
 0x34e   : > { %v396_v31 = vmul.f32 %v2805_v26, %v395_v30 }
 0x350   : > { %2594 = vmatmul.mubr.msk.f32.vlgmr.msra.gmra.mxu1 %vm384_vm3, %v396_v31 }
 0x351   : > { %2608 = vmatpush3.xpose.msk.msra.mxu1 %vm309_vm2, %v559_v32  ;;  %2609 = vmatprep.mubr.msk.f32.mxu1 %vm2899_vm0, %v2898_v1 }
 0x352   : > { %2612 = vmatprep.subr.mxu1 %v2898_v1 }
 0x354   : > { %2610 = vmatmul.mubr.msk.f32.vlgmr.msra.gmra.mxu1 %vm309_vm2, %v554_v21  ;;  %v2454_v21 = vld [vmem:[%s3360_s1 + $0x90] sm:$0xff] }
 0x355   : > { %2613 = vmatpush3.msra.mxu1 %v647_v33  ;;  %2614 = vmatprep.mubr.msk.f32.mxu1 %vm2899_vm0, %v2898_v1 }
 0x356   : > { %2628 = vmatprep.subr.mxu1 %v2898_v1  ;;  %2662 = vmatpush3.msra.mxu0 %v2454_v21 }
 0x357   : > { %2663 = vmatprep.subr.mxu0 %v2898_v1 }
 0x358   : > { %2664 = vmatpush3.msra.mxu0 %v2453_v22 }
 0x359   : > { %2665 = vmatprep.subr.mxu0 %v2898_v1 }
 0x35a   : > { %2666 = vmatpush3.msra.mxu0 %v2452_v23  ;;  %v2477_v23 = vld [vmem:[%s3361_s2 + $0x6] ss:$0 sm:$0xff] }
 0x35b   : > { %2668 = vmatmul.mubr.msk.f32.vlgmr.msra.gmra.mxu0 %vm232_vm1, %v3013_v5  ;;  %2680 = vmatprep.subr.mxu0 %v2898_v1 }
 0x35c   : > { %2688 = vmatprep.mubr.msk.f32.mxu0 %vm2899_vm0, %v2898_v1  ;;  %2681 = vmatpush3.msra.mxu0 %v2465_v43 }
 0x35d   : > { %2682 = vmatprep.subr.mxu0 %v2898_v1 }
 0x35e   : > { %2683 = vmatpush3.msra.mxu0 %v2464_v44 }
 0x35f   : > { %2684 = vmatprep.subr.mxu0 %v2898_v1 }
 0x410   : > { %v469_v38 = vpop.f32.mrf.mxu1 }
 0x411   : > { %473 = vst.msk [vmem:[#allocation2] sm:$0xff] %vm309_vm2, %v469_v38 }
 0x412   : > { %v2595_v39 = vpop.f32.mrf.mxu1 }
 0x414   : > { %v630_v40 = vpop.f32.mrf.mxu1 }
 0x415   : > { %v634_v41 = vsel %vm384_vm3, %v630_v40, -inf }
 0x416   : > { %635 = vmax.xlane.f32.xlu1 %v634_v41  ;;  %v2611_v42 = vpop.f32.mrf.mxu1 }
 0x41b   : > { %v1315_v29 = vpop.f32.mrf.mxu0 }
 0x41c   : > { %v1316_v37 = vadd.f32 %v2457_v36, %v1315_v29 }
 0x41d   : > { %v2669_v30 = vpop.f32.mrf.mxu0 }
 0x49f   : > { %v636_v45 = vpop.xlane.xlu1 %635 }
 0x4a0   : > { %v637_v46 = vsub.f32 %v630_v40, %v636_v45  ;;  %v2463_v45 = vld [vmem:[%s3360_s1 + $0xa8] sm:$0xff] }
 0x4a1   : > { %2685 = vmatpush3.msra.mxu0 %v2463_v45 }
 0x4a2   : > { %v638_v47 = vmul.f32 1.442695, %v637_v46  ;;  %v2462_v46 = vld [vmem:[%s3360_s1 + $0xa0] sm:$0xff]  ;;  %2686 = vmatprep.subr.mxu0 %v2898_v1 }
 0x4a3   : > { %2687 = vmatpush3.msra.mxu0 %v2462_v46 }
 0x4a4   : > { %2808 = vpow2.f32 %v638_v47  ;;  %2689 = vmatmul.mubr.msk.f32.vlgmr.msra.gmra.mxu0 %vm232_vm1, %v3013_v5  ;;  %2701 = vmatprep.subr.mxu0 %v2898_v1 }
 0x4a5   : > { %2709 = vmatprep.mubr.msk.f32.mxu0 %vm2899_vm0, %v2898_v1  ;;  %2702 = vmatpush3.msra.mxu0 %v2475_v7 }
 0x4a6   : > { %2703 = vmatprep.subr.mxu0 %v2898_v1 }
 0x4b1   : > { %v2809_v48 = vpop.eup %2808 }
 0x4b2   : > { %v640_v49 = vsel %vm384_vm3, %v2809_v48, 0.0 }
 0x4b3   : > { %641 = vadd.xlane.f32.xlu0 %v640_v49 }
 0x4c9   : > { %812 = vrot.lane.b32.xlu0 %v808_v51, %s2901_s9 }
 0x53c   : > { %v642_v52 = vpop.xlane.xlu0 %641 }
 0x53d   : > { %2810 = vrcp.f32 %v642_v52  ;;  %v2467_v52 = vld [vmem:[%s3361_s2 + $0x5] ss:$0 sm:$0xff] }
 0x540   : > { %v813_v56 = vpop.permute.xlu0 %812 }
 0x54a   : > { %v2811_v53 = vpop.eup %2810 }
 0x54b   : > { %v644_v54 = vmul.f32 0.17677669, %v2811_v53 }
 0x54d   : > { %v645_v55 = vmul.f32 %v2809_v48, %v644_v54 }
 0x54f   : > { %2615 = vmatmul.mubr.msk.f32.vlgmr.msra.gmra.mxu1 %vm384_vm3, %v645_v55 }
 0x550   : > { %2629 = vmatpush3.xpose.msk.msra.mxu1 %vm309_vm2, %v813_v56  ;;  %2630 = vmatprep.mubr.msk.f32.mxu1 %vm2899_vm0, %v2898_v1 }
 0x551   : > { %2633 = vmatprep.subr.mxu1 %v2898_v1 }
 0x553   : > { %2631 = vmatmul.mubr.msk.f32.vlgmr.msra.gmra.mxu1 %vm309_vm2, %v808_v51 }
 0x554   : > { %2635 = vmatprep.mubr.msk.f32.mxu1 %vm2899_vm0, %v2898_v1 }
 0x564   : > { %v1569_v53 = vpop.f32.mrf.mxu0 }
 0x565   : > { %v1570_v54 = vadd.f32 %v2467_v52, %v1569_v53 }
 0x566   : > { %v2690_v55 = vpop.f32.mrf.mxu0 }
 0x60f   : > { %v3123_v61 = vpop.f32.mrf.mxu1 }
 0x611   : > { %v2616_v62 = vpop.f32.mrf.mxu1 }
 0x613   : > { %v884_v63 = vpop.f32.mrf.mxu1 }
 0x614   : > { %v888_v0 = vsel %vm384_vm3, %v884_v63, -inf }
 0x615   : > { %889 = vmax.xlane.f32.xlu1 %v888_v0  ;;  %v2632_v2 = vpop.f32.mrf.mxu1 }
 0x626   : > { %900 = vrot.lane.b32.xlu1 %v808_v51, %s2900_s8 }
 0x62a   : > { %1066 = vrot.lane.b32.xlu1 %v1062_v6, %s2901_s9 }
 0x69e   : > { %v890_v8 = vpop.xlane.xlu1 %889 }
 0x69f   : > { %v891_v9 = vsub.f32 %v884_v63, %v890_v8  ;;  %v2474_v8 = vld [vmem:[%s3360_s1 + $0xd0] sm:$0xff] }
 0x6a0   : > { %2704 = vmatpush3.msra.mxu0 %v2474_v8 }
 0x6a1   : > { %v892_v10 = vmul.f32 1.442695, %v891_v9  ;;  %2705 = vmatprep.subr.mxu0 %v2898_v1  ;;  %v2473_v9 = vld [vmem:[%s3360_s1 + $0xc8] sm:$0xff] }
 0x6a2   : > { %v901_v11 = vpop.permute.xlu1 %900  ;;  %2706 = vmatpush3.msra.mxu0 %v2473_v9 }
 0x6a3   : > { %2812 = vpow2.f32 %v892_v10  ;;  %2634 = vmatpush3.msra.mxu1 %v901_v11  ;;  %v2472_v10 = vld [vmem:[%s3360_s1 + $0xc0] sm:$0xff]  ;;  %2707 = vmatprep.subr.mxu0 %v2898_v1 }
 0x6a4   : > { %2649 = vmatprep.subr.mxu1 %v2898_v1  ;;  %2708 = vmatpush3.msra.mxu0 %v2472_v10 }
 0x6a5   : > { %2710 = vmatmul.mubr.msk.f32.vlgmr.msra.gmra.mxu0 %vm232_vm1, %v3013_v5  ;;  %2722 = vmatprep.subr.mxu0 %v2898_v1 }
 0x6a6   : > { %v1067_v18 = vpop.permute.xlu1 %1066  ;;  %2730 = vmatprep.mubr.msk.f32.mxu0 %vm2899_vm0, %v2898_v1 }
 0x6b0   : > { %v2813_v12 = vpop.eup %2812 }
 0x6b1   : > { %v894_v13 = vsel %vm384_vm3, %v2813_v12, 0.0 }
 0x6b2   : > { %895 = vadd.xlane.f32.xlu0 %v894_v13 }
 0x6c8   : > { %1154 = vrot.lane.b32.xlu0 %v1062_v6, %s2900_s8 }
 0x73b   : > { %v896_v14 = vpop.xlane.xlu0 %895 }
 0x73c   : > { %2814 = vrcp.f32 %v896_v14 }
 0x73f   : > { %v1155_v19 = vpop.permute.xlu0 %1154 }
 0x749   : > { %v2815_v15 = vpop.eup %2814 }
 0x74a   : > { %v898_v16 = vmul.f32 0.17677669, %v2815_v15 }
 0x74c   : > { %v899_v17 = vmul.f32 %v2813_v12, %v898_v16 }
 0x74e   : > { %2636 = vmatmul.mubr.msk.f32.vlgmr.msra.gmra.mxu1 %vm384_vm3, %v899_v17 }
 0x74f   : > { %2650 = vmatpush3.xpose.msk.msra.mxu1 %vm309_vm2, %v1067_v18  ;;  %2651 = vmatprep.mubr.msk.f32.mxu1 %vm2899_vm0, %v2898_v1 }
 0x750   : > { %2654 = vmatprep.subr.mxu1 %v2898_v1 }
 0x752   : > { %2652 = vmatmul.mubr.msk.f32.vlgmr.msra.gmra.mxu1 %vm309_vm2, %v1062_v6 }
 0x753   : > { %2655 = vmatpush3.msra.mxu1 %v1155_v19  ;;  %2656 = vmatprep.mubr.msk.f32.mxu1 %vm2899_vm0, %v2898_v1 }
 0x754   : > { %2670 = vmatprep.subr.mxu1 %v2898_v1 }
 0x765   : > { %v1823_v16 = vpop.f32.mrf.mxu0 }
 0x767   : > { %v2711_v17 = vpop.f32.mrf.mxu0 }
 0x80e   : > { %v3163_v24 = vpop.f32.mrf.mxu1 }
 0x810   : > { %v2637_v25 = vpop.f32.mrf.mxu1 }
 0x811   : > { %v1824_v25 = vadd.f32 %v2477_v23, %v1823_v16 }
 0x812   : > { %v1138_v26 = vpop.f32.mrf.mxu1 }
 0x813   : > { %v1142_v27 = vsel %vm384_vm3, %v1138_v26, -inf }
 0x814   : > { %1143 = vmax.xlane.f32.xlu1 %v1142_v27  ;;  %v2653_v28 = vpop.f32.mrf.mxu1 }
 0x89d   : > { %v1144_v31 = vpop.xlane.xlu1 %1143 }
 0x89e   : > { %v1145_v32 = vsub.f32 %v1138_v26, %v1144_v31  ;;  %v2485_v31 = vld [vmem:[%s3360_s1 + $0xf8] sm:$0xff] }
 0x89f   : > { %2723 = vmatpush3.msra.mxu0 %v2485_v31 }
 0x8a0   : > { %v1146_v33 = vmul.f32 1.442695, %v1145_v32  ;;  %2724 = vmatprep.subr.mxu0 %v2898_v1  ;;  %v2484_v32 = vld [vmem:[%s3360_s1 + $0xf0] sm:$0xff] }
 0x8a1   : > { %2725 = vmatpush3.msra.mxu0 %v2484_v32 }
 0x8a2   : > { %2816 = vpow2.f32 %v1146_v33  ;;  %2726 = vmatprep.subr.mxu0 %v2898_v1  ;;  %v2483_v33 = vld [vmem:[%s3360_s1 + $0xe8] sm:$0xff] }
 0x8a3   : > { %2727 = vmatpush3.msra.mxu0 %v2483_v33 }
 0x8a4   : > { %2728 = vmatprep.subr.mxu0 %v2898_v1 }
 0x8af   : > { %v2817_v34 = vpop.eup %2816 }
 0x8b0   : > { %v1148_v35 = vsel %vm384_vm3, %v2817_v34, 0.0 }
 0x8b1   : > { %1149 = vadd.xlane.f32.xlu0 %v1148_v35 }
 0x8c7   : > { %1320 = vrot.lane.b32.xlu0 %v1316_v37, %s2901_s9 }
 0x93a   : > { %v1150_v38 = vpop.xlane.xlu0 %1149 }
 0x93b   : > { %2818 = vrcp.f32 %v1150_v38 }
 0x93e   : > { %v1321_v42 = vpop.permute.xlu0 %1320 }
 0x948   : > { %v2819_v39 = vpop.eup %2818 }
 0x949   : > { %v1152_v40 = vmul.f32 0.17677669, %v2819_v39 }
 0x94b   : > { %v1153_v41 = vmul.f32 %v2817_v34, %v1152_v40  ;;  %v2482_v34 = vld [vmem:[%s3360_s1 + $0xe0] sm:$0xff] }
 0x94c   : > { %2729 = vmatpush3.msra.mxu0 %v2482_v34  ;;  %v2487_v40 = vld [vmem:[%s3361_s2 + $0x7] ss:$0 sm:$0xff] }
 0x94d   : > { %2657 = vmatmul.mubr.msk.f32.vlgmr.msra.gmra.mxu1 %vm384_vm3, %v1153_v41  ;;  %2731 = vmatmul.mubr.msk.f32.vlgmr.msra.gmra.mxu0 %vm232_vm1, %v3013_v5 }
 0x94e   : > { %2671 = vmatpush3.xpose.msk.msra.mxu1 %vm309_vm2, %v1321_v42  ;;  %2672 = vmatprep.mubr.msk.f32.mxu1 %vm2899_vm0, %v2898_v1 }
 0x94f   : > { %2675 = vmatprep.subr.mxu1 %v2898_v1  ;;  %2743 = vmatprep.subr.mxu0 %v2898_v1 }
 0x950   : > { %2751 = vmatprep.mubr.msk.f32.mxu0 %vm2899_vm0, %v2898_v1 }
 0x951   : > { %2673 = vmatmul.mubr.msk.f32.vlgmr.msra.gmra.mxu1 %vm309_vm2, %v1316_v37 }
 0x952   : > { %2677 = vmatprep.mubr.msk.f32.mxu1 %vm2899_vm0, %v2898_v1 }
 0xa0d   : > { %v3199_v47 = vpop.f32.mrf.mxu1  ;;  %v2077_v41 = vpop.f32.mrf.mxu0 }
 0xa0e   : > { %v2078_v5 = vadd.f32 %v2487_v40, %v2077_v41 }
 0xa0f   : > { %v2658_v48 = vpop.f32.mrf.mxu1  ;;  %v2732_v42 = vpop.f32.mrf.mxu0 }
 0xa11   : > { %v1392_v49 = vpop.f32.mrf.mxu1 }
 0xa12   : > { %v1396_v50 = vsel %vm384_vm3, %v1392_v49, -inf }
 0xa13   : > { %1397 = vmax.xlane.f32.xlu1 %v1396_v50  ;;  %v2674_v51 = vpop.f32.mrf.mxu1 }
 0xa24   : > { %1408 = vrot.lane.b32.xlu1 %v1316_v37, %s2900_s8 }
 0xa28   : > { %1574 = vrot.lane.b32.xlu1 %v1570_v54, %s2901_s9 }
 0xa9c   : > { %v1398_v56 = vpop.xlane.xlu1 %1397 }
 0xa9d   : > { %v1399_v57 = vsub.f32 %v1392_v49, %v1398_v56 }
 0xa9f   : > { %v1400_v58 = vmul.f32 1.442695, %v1399_v57 }
 0xaa0   : > { %v1409_v59 = vpop.permute.xlu1 %1408 }
 0xaa1   : > { %2820 = vpow2.f32 %v1400_v58  ;;  %2676 = vmatpush3.msra.mxu1 %v1409_v59 }
 0xaa2   : > { %2691 = vmatprep.subr.mxu1 %v2898_v1 }
 0xaa4   : > { %v1575_v4 = vpop.permute.xlu1 %1574 }
 0xaae   : > { %v2821_v60 = vpop.eup %2820 }
 0xaaf   : > { %v1402_v62 = vsel %vm384_vm3, %v2821_v60, 0.0 }
 0xab0   : > { %1403 = vadd.xlane.f32.xlu0 %v1402_v62 }
 0xac6   : > { %1662 = vrot.lane.b32.xlu0 %v1570_v54, %s2900_s8 }
 0xb39   : > { %v1404_v63 = vpop.xlane.xlu0 %1403 }
 0xb3a   : > { %2822 = vrcp.f32 %v1404_v63 }
 0xb3d   : > { %v1663_v6 = vpop.permute.xlu0 %1662 }
 0xb47   : > { %v2823_v0 = vpop.eup %2822 }
 0xb48   : > { %v1406_v2 = vmul.f32 0.17677669, %v2823_v0 }
 0xb4a   : > { %v1407_v3 = vmul.f32 %v2821_v60, %v1406_v2 }
 0xb4c   : > { %2678 = vmatmul.mubr.msk.f32.vlgmr.msra.gmra.mxu1 %vm384_vm3, %v1407_v3 }
 0xb4d   : > { %2692 = vmatpush3.xpose.msk.msra.mxu1 %vm309_vm2, %v1575_v4  ;;  %2693 = vmatprep.mubr.msk.f32.mxu1 %vm2899_vm0, %v2898_v1 }
 0xb4e   : > { %2696 = vmatprep.subr.mxu1 %v2898_v1 }
 0xb50   : > { %2694 = vmatmul.mubr.msk.f32.vlgmr.msra.gmra.mxu1 %vm309_vm2, %v1570_v54 }
 0xb51   : > { %2697 = vmatpush3.msra.mxu1 %v1663_v6  ;;  %2698 = vmatprep.mubr.msk.f32.mxu1 %vm2899_vm0, %v2898_v1 }
 0xb52   : > { %2712 = vmatprep.subr.mxu1 %v2898_v1 }
 0xc0c   : > { %v3239_v11 = vpop.f32.mrf.mxu1 }
 0xc0e   : > { %v2679_v12 = vpop.f32.mrf.mxu1 }
 0xc0f   : > { %v2256_v12 = vld [vmem:[%s3362_s3 + $0x18] sm:$0xff] }
 0xc10   : > { %v1646_v13 = vpop.f32.mrf.mxu1  ;;  %2744 = vmatpush3.msra.mxu0 %v2256_v12 }
 0xc11   : > { %v1650_v14 = vsel %vm384_vm3, %v1646_v13, -inf  ;;  %2745 = vmatprep.subr.mxu0 %v2898_v1 }
 0xc12   : > { %1651 = vmax.xlane.f32.xlu1 %v1650_v14  ;;  %v2695_v15 = vpop.f32.mrf.mxu1  ;;  %v2254_v14 = vld [vmem:[%s3362_s3 + $0x8] sm:$0xff] }
 0xc13   : > { %v2253_v15 = vld [vmem:[%s3362_s3] sm:$0xff] }
 0xc9b   : > { %v1652_v18 = vpop.xlane.xlu1 %1651 }
 0xc9c   : > { %v1653_v19 = vsub.f32 %v1646_v13, %v1652_v18  ;;  %v2255_v13 = vld [vmem:[%s3362_s3 + $0x10] sm:$0xff] }
 0xc9d   : > { %2746 = vmatpush3.msra.mxu0 %v2255_v13 }
 0xc9e   : > { %v1654_v20 = vmul.f32 1.442695, %v1653_v19  ;;  %2747 = vmatprep.subr.mxu0 %v2898_v1 }
 0xc9f   : > { %2748 = vmatpush3.msra.mxu0 %v2254_v14 }
 0xca0   : > { %2824 = vpow2.f32 %v1654_v20  ;;  %2749 = vmatprep.subr.mxu0 %v2898_v1  ;;  %v2492_v20 = vld [vmem:[%s3363_s4] ss:$0 sm:$0xff] }
 0xca1   : > { %2750 = vmatpush3.msra.mxu0 %v2253_v15 }
 0xcad   : > { %v2825_v21 = vpop.eup %2824 }
 0xcae   : > { %v1656_v22 = vsel %vm384_vm3, %v2825_v21, 0.0 }
 0xcaf   : > { %1657 = vadd.xlane.f32.xlu0 %v1656_v22 }
 0xcc5   : > { %1828 = vrot.lane.b32.xlu0 %v1824_v25, %s2901_s9 }
 0xd38   : > { %v1658_v26 = vpop.xlane.xlu0 %1657 }
 0xd39   : > { %2826 = vrcp.f32 %v1658_v26 }
 0xd3c   : > { %v1829_v30 = vpop.permute.xlu0 %1828 }
 0xd46   : > { %v2827_v27 = vpop.eup %2826 }
 0xd47   : > { %v1660_v28 = vmul.f32 0.17677669, %v2827_v27 }
 0xd49   : > { %v1661_v29 = vmul.f32 %v2825_v21, %v1660_v28 }
 0xd4b   : > { %2699 = vmatmul.mubr.msk.f32.vlgmr.msra.gmra.mxu1 %vm384_vm3, %v1661_v29 }
 0xd4c   : > { %2713 = vmatpush3.xpose.msk.msra.mxu1 %vm309_vm2, %v1829_v30  ;;  %2714 = vmatprep.mubr.msk.f32.mxu1 %vm2899_vm0, %v2898_v1 }
 0xd4d   : > { %2717 = vmatprep.subr.mxu1 %v2898_v1 }
 0xd4f   : > { %2715 = vmatmul.mubr.msk.f32.vlgmr.msra.gmra.mxu1 %vm309_vm2, %v1824_v25 }
 0xd50   : > { %2719 = vmatprep.mubr.msk.f32.mxu1 %vm2899_vm0, %v2898_v1 }
 0xe0b   : > { %v1734_v35 = vpop.f32.mrf.mxu1 }
 0xe0d   : > { %v2700_v36 = vpop.f32.mrf.mxu1 }
 0xe0f   : > { %v1900_v37 = vpop.f32.mrf.mxu1 }
 0xe10   : > { %v1904_v38 = vsel %vm384_vm3, %v1900_v37, -inf }
 0xe11   : > { %1905 = vmax.xlane.f32.xlu1 %v1904_v38  ;;  %v2716_v39 = vpop.f32.mrf.mxu1 }
 0xe22   : > { %1916 = vrot.lane.b32.xlu1 %v1824_v25, %s2900_s8 }
 0xe26   : > { %2082 = vrot.lane.b32.xlu1 %v2078_v5, %s2901_s9  ;;  %s2902_s9 = smov 8  }
 0xe9a   : > { %v1906_v43 = vpop.xlane.xlu1 %1905 }
 0xe9b   : > { %v1907_v44 = vsub.f32 %v1900_v37, %v1906_v43 }
 0xe9d   : > { %v1908_v45 = vmul.f32 1.442695, %v1907_v44 }
 0xe9e   : > { %v1917_v46 = vpop.permute.xlu1 %1916 }
 0xe9f   : > { %2828 = vpow2.f32 %v1908_v45  ;;  %2718 = vmatpush3.msra.mxu1 %v1917_v46 }
 0xea0   : > { %2733 = vmatprep.subr.mxu1 %v2898_v1 }
 0xea2   : > { %v2083_v54 = vpop.permute.xlu1 %2082 }
 0xeac   : > { %v2829_v48 = vpop.eup %2828 }
 0xead   : > { %v1910_v49 = vsel %vm384_vm3, %v2829_v48, 0.0 }
 0xeae   : > { %1911 = vadd.xlane.f32.xlu0 %v1910_v49 }
 0xf37   : > { %v1912_v50 = vpop.xlane.xlu0 %1911 }
 0xf38   : > { %2830 = vrcp.f32 %v1912_v50 }
 0xf45   : > { %v2831_v51 = vpop.eup %2830 }
 0xf46   : > { %v1914_v52 = vmul.f32 0.17677669, %v2831_v51 }
 0xf48   : > { %v1915_v53 = vmul.f32 %v2829_v48, %v1914_v52 }
 0xf4a   : > { %2720 = vmatmul.mubr.msk.f32.vlgmr.msra.gmra.mxu1 %vm384_vm3, %v1915_v53 }
 0xf4b   : > { %2734 = vmatpush3.xpose.msk.msra.mxu1 %vm309_vm2, %v2083_v54  ;;  %2735 = vmatprep.mubr.msk.f32.mxu1 %vm2899_vm0, %v2898_v1 }
 0xf4c   : > { %2738 = vmatprep.subr.mxu1 %v2898_v1 }
 0xf4e   : > { %2736 = vmatmul.mubr.msk.f32.vlgmr.msra.gmra.mxu1 %vm309_vm2, %v2078_v5 }
 0xf4f   : > { %2740 = vmatprep.mubr.msk.f32.mxu1 %vm2899_vm0, %v2898_v1 }
0x100a   : > { %v1988_v55 = vpop.f32.mrf.mxu1 }
0x100c   : > { %v2721_v56 = vpop.f32.mrf.mxu1 }
0x100e   : > { %v2154_v57 = vpop.f32.mrf.mxu1 }
0x100f   : > { %v2158_v58 = vsel %vm384_vm3, %v2154_v57, -inf }
0x1010   : > { %2159 = vmax.xlane.f32.xlu1 %v2158_v58  ;;  %v2737_v59 = vpop.f32.mrf.mxu1 }
0x1021   : > { %977 = vrot.lane.b32.xlu1 %v3163_v24, %s2902_s9  ;;  %s2415_s9 = sshll.u32 %s213_s25, 3 }
0x1099   : > { %v2160_v60 = vpop.xlane.xlu1 %2159 }
0x109a   : > { %v2161_v62 = vsub.f32 %v2154_v57, %v2160_v60 }
0x109c   : > { %v2162_v63 = vmul.f32 1.442695, %v2161_v62 }
0x109d   : > { %v978_v6 = vpop.permute.xlu1 %977 }
0x109e   : > { %2832 = vpow2.f32 %v2162_v63 }
0x10ab   : > { %v2833_v0 = vpop.eup %2832 }
0x10ac   : > { %v2164_v2 = vsel %vm384_vm3, %v2833_v0, 0.0 }
0x10ad   : > { %2165 = vadd.xlane.f32.xlu0 %v2164_v2 }
0x10c3   : > { %2170 = vrot.lane.b32.xlu0 %v2078_v5, %s2900_s8 }
0x10c7   : > { %723 = vrot.lane.b32.xlu0 %v3123_v61, %s2903_s26 }
0x10cb   : > { %1231 = vrot.lane.b32.xlu0 %v3199_v47, %s2904_s30 }
0x10cf   : > { %1485 = vrot.lane.b32.xlu0 %v3239_v11, %s2905_s6  ;;  %s2495_s6 = sshll.u32 %s2961_s22, 7  ;;  %s2909_s22 = smov [#allocation3]  }
0x10d0   : > { %s3323_s12 = scalar_lea.hbm %s3364_s5, %s2495_s6  ;;  %s2840_s15 = sshll.u32 %s2909_s22, 4  ;;  %s2841_s15 = int_to_ptr.vmem [resolvable:$false] %s2840_s15 }
0x10d1   : > { %s2842_s16 = scalar_lea.vmem %s2841_s15, 256 }
0x10d3   : > { %1739 = vrot.lane.b32.xlu0 %v1734_v35, %s2906_s7  ;;  %s215_s7 = scalar_lea.vmem [#allocation3], %s2415_s9 }
0x10d7   : > { %1993 = vrot.lane.b32.xlu0 %v1988_v55, %s2907_s10  ;;  %s2352_s10 = sshll.u32 %s215_s7, 4  ;;  %s2353_s10 = int_to_ptr.vmem [resolvable:$true] %s2352_s10 }
0x10d8   : > { %s2836_s14 = scalar_lea.vmem %s2353_s10, 128  ;;  %p2843_p0 = scmp.lt.s32.totalorder %s2353_s10, %s2841_s15 }
0x10d9   : > { %p2837_p11 = scmp.ne.s32.totalorder %s2353_s10, %s2836_s14  ;;  %p2844_p1 = scmp.lt.s32.totalorder %s2842_s16, %s2836_s14 }
0x10db   : > { %p2838_p12 = pnand %p2837_p11, %p2978_p5  ;;  %p2845_p2 = por %p2844_p1, %p2843_p0 }
0x10dd   : > { %p2839_p13 = pneg %p2838_p12 }
0x10df   : > { %p2846_p3 = pnand %p2845_p2, %p2839_p13 }
0x1136   : > { %v2166_v24 = vpop.xlane.xlu0 %2165 }
0x1137   : > { %2834 = vrcp.f32 %v2166_v24 }
0x113a   : > { %v2171_v3 = vpop.permute.xlu0 %2170 }
0x113b   : > { %2739 = vmatpush3.msra.mxu1 %v2171_v3 }
0x113e   : > { %v724_v4 = vpop.permute.xlu0 %723 }
0x113f   : > { %727 = vst.msk [vmem:[#allocation2] sm:$0xff] %vm726_vm4, %v724_v4 }
0x1140   : > { %981 = vst.msk [vmem:[#allocation2] sm:$0xff] %vm980_vm5, %v978_v6 }
0x1142   : > { %v1232_v61 = vpop.permute.xlu0 %1231 }
0x1143   : > { %1235 = vst.msk [vmem:[#allocation2] sm:$0xff] %vm1234_vm6, %v1232_v61 }
0x1144   : > { %v2835_v47 = vpop.eup %2834 }
0x1145   : > { %v2168_v7 = vmul.f32 0.17677669, %v2835_v47 }
0x1146   : > { %v1486_v8 = vpop.permute.xlu0 %1485 }
0x1147   : > { %v2169_v9 = vmul.f32 %v2833_v0, %v2168_v7  ;;  %1489 = vst.msk [vmem:[#allocation2] sm:$0xff] %vm1488_vm7, %v1486_v8 }
0x1149   : > { %2741 = vmatmul.mubr.msk.f32.vlgmr.msra.gmra.mxu1 %vm384_vm3, %v2169_v9 }
0x114a   : > { %v1740_v10 = vpop.permute.xlu0 %1739 }
0x114b   : > { %1743 = vst.msk [vmem:[#allocation2] sm:$0xff] %vm1742_vm8, %v1740_v10 }
0x114e   : > { %v1994_v11 = vpop.permute.xlu0 %1993 }
0x114f   : > { %1997 = vst.msk [vmem:[#allocation2] sm:$0xff] %vm1996_vm9, %v1994_v11 }
0x1209   : > { %v2242_v16 = vpop.f32.mrf.mxu1 }
0x120a   : > { %2247 = vrot.lane.b32.xlu1 %v2242_v16, %s2908_s23 }
0x120b   : > { %v2742_v17 = vpop.f32.mrf.mxu1 }
0x127c   : > { %v2248_v18 = vpop.permute.xlu1 %2247 }
0x127d   : > { %2251 = vst.msk [vmem:[#allocation2] sm:$0xff] %vm2250_vm10, %v2248_v18 }
0x1284   : > { %v2252_v19 = vld [vmem:[#allocation2] sm:$0xff] }
0x1285   : > { %2752 = vmatmul.mubr.msk.f32.vlgmr.msra.gmra.mxu0 %vm232_vm1, %v2252_v19 }
0x1345   : > { %v2333_v1 = vpop.f32.mrf.mxu0 }
0x1346   : > { %v2334_v21 = vadd.f32 %v2492_v20, %v2333_v1 }
0x1347   : > { %v2753_v22 = vpop.f32.mrf.mxu0 }
0x1348   : > { %2337 = vst.msk [vmem:[%s215_s7] sm:$0xff] %vm232_vm1, %v2334_v21 }
0x1349   : > { %2849 = shalt.err (!%p2846_p3)
}
0x134a   : > { %s2850_s17 = scalar_lea.hbm %s3323_s12, 128  ;;  %s2854_s9 = scalar_lea.hbm %s3364_s5, 256 }
0x134b   : > { %p2851_p4 = scmp.ne.s32.totalorder %s3323_s12, %s2850_s17  ;;  %p2855_p9 = scmp.lt.s32.totalorder %s3323_s12, %s3364_s5 }
0x134c   : > { %p2856_p10 = scmp.lt.s32.totalorder %s2854_s9, %s2850_s17 }
0x134d   : > { %p2852_p7 = pnand %p2851_p4, %p2978_p5 }
0x134e   : > { %p2857_p11 = por %p2856_p10, %p2855_p9 }
0x134f   : > { %p2853_p8 = pneg %p2852_p7 }
0x1351   : > { %p2858_p12 = pnand %p2857_p11, %p2853_p8 }
0x1353   : > { %2861 = shalt.err (!%p2858_p12)
}
0x1354   : > { %2754 = dma.vmem_to_hbm [thread:$0]  (%p2978_p5), %s2353_s10, 128, %s3323_s12, %s2339_s13  }
0x1355 PF: > { %p2760_p13 = scmp.ge.s32.totalorder %s2896_s21, 2  ;;  %s2364_s6 = sand.u32 1, %s2884_s18  }
0x1356   : > { %s2365_s7 = scalar_lea.sflag [#allocation4], %s2364_s6 }
0x1357   : > { %p2757_p0 = pnand %p2760_p13, %p2982_p6 }
0x1359   : > { %p2758_p1 = pneg %p2757_p0 }
0x135b   : > { %2879 = dma.done.wait (%p2758_p1), %s2365_s7, 128  }
0x135c   : > { %2881 = vsyncadd (%p2758_p1), %s2365_s7, 4294967168  ;;  %p15_p2 = scmp.ge.s32.totalorder %s2965_s24, 4   ;;  %s3367_s18 = smov %s2888_s19 }
0x135d   : > { %s3368_s19 = smov %s2892_s20  ;;  %s3369_s20 = smov %s2976_s27 }
0x135e   : > { %s3370_s21 = smov %s2965_s24  ;;  %17 = sbr.rel (!%p15_p2) target bundleno = 3 (0x3), region = 89 }
0x1363   :  { %2370 = vsyncpa [#allocation4], 1 }
0x1364   :  { %2372 = vsyncpa [#allocation4 + $0x1], 1 }

</bundles_post_ra>
